<compile_context>
chip_gen: v7x
topology: tpu7x:2x2x1
jax: 0.10.0
libtpu: 0.0.40
codegen_flags: <defaults>
</compile_context>

<pallas_src>
import math

import jax
import jax.numpy as jnp
from jax.experimental import pallas as pl
from jax.experimental.pallas import tpu as pltpu

EPS_BN = 1e-5      # nn.BatchNorm1d default eps
EPS_NORM = 1e-12   # F.normalize default eps


# ---------------------------------------------------------------------------
# In-kernel helpers
# ---------------------------------------------------------------------------
def _l2_normalize_rows(x):
    # F.normalize(x, dim=1): x / max(||x||_2, eps); rsqrt goes to the EUP slot.
    ssq = jnp.sum(x * x, axis=1, keepdims=True)
    inv = jax.lax.rsqrt(ssq)
    return jnp.where(ssq > (EPS_NORM * EPS_NORM), x * inv, x * (1.0 / EPS_NORM))


def _mlp_head(z, w1, b1, g, be, w2, b2):
    # Linear -> BatchNorm1d (training mode: this batch's biased stats) -> ReLU -> Linear
    h = jnp.dot(z, w1, preferred_element_type=jnp.float32) + b1
    mu = jnp.mean(h, axis=0, keepdims=True)
    d = h - mu
    var = jnp.mean(d * d, axis=0, keepdims=True)
    hn = d * jax.lax.rsqrt(var + EPS_BN) * g + be
    r = jnp.maximum(hn, 0.0)
    return jnp.dot(r, w2, preferred_element_type=jnp.float32) + b2


# ---------------------------------------------------------------------------
# Single fused Pallas kernel (whole arrays resident in VMEM; no grid)
# ---------------------------------------------------------------------------
def _byol_kernel(wm_ref, q_ref, k_ref, ow_ref, ob_ref, w1_ref, b1_ref,
                 g_ref, be_ref, w2_ref, b2_ref, tw_ref, tb_ref,
                 logits_ref, labels_ref, nw_ref, nb_ref):
    B = q_ref.shape[0]

    qx = q_ref[...]
    kx = k_ref[...]
    ow = ow_ref[...]
    ob = ob_ref[...]
    w1 = w1_ref[...]
    b1 = b1_ref[...]
    g = g_ref[...]
    be = be_ref[...]
    w2 = w2_ref[...]
    b2 = b2_ref[...]

    # --- online path: mlp(online_encoder(q)), mlp(online_encoder(k)) ---------
    # BN stats are per view, faithful to the two separate mlp() calls in torch.
    zq = jnp.dot(qx, ow, preferred_element_type=jnp.float32) + ob
    zk = jnp.dot(kx, ow, preferred_element_type=jnp.float32) + ob
    oq = _mlp_head(zq, w1, b1, g, be, w2, b2)
    ok = _mlp_head(zk, w1, b1, g, be, w2, b2)
    logits_ref[0:B, :] = _l2_normalize_rows(oq)          # cat([q, k], dim=0)
    logits_ref[B:2 * B, :] = _l2_normalize_rows(ok)

    # --- EMA update of the target encoder (reuses the already-loaded ow/ob) --
    w = wm_ref[0]
    nw = tw_ref[...] * w + ow * (1.0 - w)
    nb = tb_ref[...] * w + ob * (1.0 - w)
    nw_ref[...] = nw
    nb_ref[...] = nb

    # --- target path: labels = cat([target(k), target(q)], dim=0), L2-normed --
    # Batch shuffle/unshuffle is omitted: it is a mathematical no-op for a
    # row-wise linear target encoder.
    tk = jnp.dot(kx, nw, preferred_element_type=jnp.float32) + nb
    tq = jnp.dot(qx, nw, preferred_element_type=jnp.float32) + nb
    labels_ref[0:B, :] = _l2_normalize_rows(tk)
    labels_ref[B:2 * B, :] = _l2_normalize_rows(tq)
    # TODO(synk): BatchNorm1d running_mean/running_var side-effect updates are
    # not tracked (pure forward; the torch forward output does not use them).


# ---------------------------------------------------------------------------
# BYOL forward (functional): mirrors BYOL.forward(q, k, step)
# The synthetic encoder is a single Linear(C*H*W -> d_output) per sample
# (encoder is an argument of the PyTorch module; a linear projector stands in).
# ---------------------------------------------------------------------------
def byol_forward(params, q, k, step, ema_weight, total_steps):
    B = q.shape[0]
    qf = q.reshape(B, -1).astype(jnp.float32)
    kf = k.reshape(B, -1).astype(jnp.float32)
    din, dout = params["online"]["w"].shape
    m = params["mlp"]

    # EMA weight (computed at trace time, passed via SMEM scalar)
    w_cos = math.cos(math.pi * step / total_steps)
    w_ema = 1.0 - (1.0 - ema_weight) * (w_cos + 1.0) / 2.0
    w_ema_arr = jnp.asarray([w_ema], dtype=jnp.float32)

    vmem = pl.BlockSpec(memory_space=pltpu.MemorySpace.VMEM)
    smem = pl.BlockSpec(memory_space=pltpu.MemorySpace.SMEM)

    logits, labels, new_w, new_b = pl.pallas_call(
        _byol_kernel,
        in_specs=[smem] + [vmem] * 12,
        out_specs=(vmem, vmem, vmem, vmem),
        out_shape=(
            jax.ShapeDtypeStruct((2 * B, dout), jnp.float32),   # logits
            jax.ShapeDtypeStruct((2 * B, dout), jnp.float32),   # labels
            jax.ShapeDtypeStruct((din, dout), jnp.float32),     # new target w
            jax.ShapeDtypeStruct((1, dout), jnp.float32),       # new target b
        ),
    )(
        w_ema_arr, qf, kf,
        params["online"]["w"], params["online"]["b"],
        m["w1"], m["b1"], m["gamma"], m["beta"], m["w2"], m["b2"],
        params["target"]["w"], params["target"]["b"],
    )
    return logits, labels, {"w": new_w, "b": new_b}


# ---------------------------------------------------------------------------
# Pure-JAX reference (for correctness verification)
# ---------------------------------------------------------------------------
def _ref_forward(params, q, k, step, ema_weight, total_steps):
    B = q.shape[0]
    qf = q.reshape(B, -1).astype(jnp.float32)
    kf = k.reshape(B, -1).astype(jnp.float32)
    m = params["mlp"]

    def enc(x, p):
        return x @ p["w"] + p["b"]

    def mlp(z):
        h = z @ m["w1"] + m["b1"]
        mu = h.mean(0, keepdims=True)
        var = ((h - mu) ** 2).mean(0, keepdims=True)
        hn = (h - mu) / jnp.sqrt(var + EPS_BN) * m["gamma"] + m["beta"]
        return jnp.maximum(hn, 0.0) @ m["w2"] + m["b2"]

    def norm(x):
        n = jnp.sqrt(jnp.sum(x * x, axis=1, keepdims=True))
        return x / jnp.maximum(n, EPS_NORM)

    logits = norm(jnp.concatenate(
        [mlp(enc(qf, params["online"])), mlp(enc(kf, params["online"]))], axis=0))
    wc = math.cos(math.pi * step / total_steps)
    we = 1.0 - (1.0 - ema_weight) * (wc + 1.0) / 2.0
    nw = params["target"]["w"] * we + params["online"]["w"] * (1.0 - we)
    nb = params["target"]["b"] * we + params["online"]["b"] * (1.0 - we)
    labels = norm(jnp.concatenate([kf @ nw + nb, qf @ nw + nb], axis=0))
    return logits, labels, nw, nb


# ---------------------------------------------------------------------------
if __name__ == "__main__":
    key = jax.random.PRNGKey(0)
    B, C, H, W = 8, 4, 8, 8            # per-view half = (8, 128): full vreg tiles
    Din = C * H * W                    # 256
    d_output, d_hidden = 128, 128      # lane-dense (multiples of 128)
    ema_weight, total_steps, step = 0.99, 100, 7

    keys = jax.random.split(key, 8)
    q = jax.random.normal(keys[0], (B, C, H, W), jnp.float32)
    k = jax.random.normal(keys[1], (B, C, H, W), jnp.float32)

    enc_w = jax.random.normal(keys[2], (Din, d_output), jnp.float32) * (1.0 / math.sqrt(Din))
    enc_b = jax.random.normal(keys[3], (1, d_output), jnp.float32) * 0.01

    params = {
        # target encoder starts as a deepcopy of the online encoder
        "online": {"w": enc_w, "b": enc_b},
        "target": {"w": enc_w, "b": enc_b},
        "mlp": {
            "w1": jax.random.normal(keys[4], (d_output, d_hidden), jnp.float32)
            * (1.0 / math.sqrt(d_output)),
            "b1": jax.random.normal(keys[5], (1, d_hidden), jnp.float32) * 0.01,
            "gamma": jnp.ones((1, d_hidden), jnp.float32),
            "beta": jnp.zeros((1, d_hidden), jnp.float32),
            "w2": jax.random.normal(keys[6], (d_hidden, d_output), jnp.float32)
            * (1.0 / math.sqrt(d_hidden)),
            "b2": jax.random.normal(keys[7], (1, d_output), jnp.float32) * 0.01,
        },
    }

    logits, labels, new_target = byol_forward(
        params, q, k, step, ema_weight, total_steps
    )
    jax.block_until_ready((logits, labels, new_target))

    # sanity checks vs. pure-JAX reference
    ref_logits, ref_labels, ref_w, ref_b = _ref_forward(
        params, q, k, step, ema_weight, total_steps
    )
    assert logits.shape == (2 * B, d_output)
    assert labels.shape == (2 * B, d_output)
    assert bool(jnp.all(jnp.isfinite(logits))) and bool(jnp.all(jnp.isfinite(labels)))
    assert bool(jnp.allclose(jnp.linalg.norm(logits, axis=1), 1.0, atol=1e-3))
    assert bool(jnp.allclose(jnp.linalg.norm(labels, axis=1), 1.0, atol=1e-3))
    assert bool(jnp.allclose(logits, ref_logits, rtol=1e-4, atol=1e-5))
    assert bool(jnp.allclose(labels, ref_labels, rtol=1e-4, atol=1e-5))
    assert bool(jnp.allclose(new_target["w"], ref_w, rtol=1e-6, atol=1e-6))
    assert bool(jnp.allclose(new_target["b"], ref_b, rtol=1e-6, atol=1e-6))

    print("KERNEL_OK")
</pallas_src>

<mosaic_0001>
module attributes {stable_mosaic.version = 11 : i64} {
  func.func @_byol_kernel(%arg0: memref<1xf32, #tpu.memory_space<smem>>, %arg1: memref<8x256xf32, #tpu.memory_space<vmem>>, %arg2: memref<8x256xf32, #tpu.memory_space<vmem>>, %arg3: memref<256x128xf32, #tpu.memory_space<vmem>>, %arg4: memref<1x128xf32, #tpu.memory_space<vmem>>, %arg5: memref<128x128xf32, #tpu.memory_space<vmem>>, %arg6: memref<1x128xf32, #tpu.memory_space<vmem>>, %arg7: memref<1x128xf32, #tpu.memory_space<vmem>>, %arg8: memref<1x128xf32, #tpu.memory_space<vmem>>, %arg9: memref<128x128xf32, #tpu.memory_space<vmem>>, %arg10: memref<1x128xf32, #tpu.memory_space<vmem>>, %arg11: memref<256x128xf32, #tpu.memory_space<vmem>>, %arg12: memref<1x128xf32, #tpu.memory_space<vmem>>, %arg13: memref<16x128xf32, #tpu.memory_space<vmem>>, %arg14: memref<16x128xf32, #tpu.memory_space<vmem>>, %arg15: memref<256x128xf32, #tpu.memory_space<vmem>>, %arg16: memref<1x128xf32, #tpu.memory_space<vmem>>) attributes {dimension_semantics = [], scalar_prefetch = 0 : i64, scratch_operands = 0 : i64, tpu.core_type = #tpu.core_type<tc>} {
    %c0 = arith.constant 0 : index
    %c0_0 = arith.constant 0 : index
    %0 = vector.load %arg1[%c0, %c0_0] : memref<8x256xf32, #tpu.memory_space<vmem>>, vector<8x256xf32>
    %c0_1 = arith.constant 0 : index
    %c0_2 = arith.constant 0 : index
    %1 = vector.load %arg2[%c0_1, %c0_2] : memref<8x256xf32, #tpu.memory_space<vmem>>, vector<8x256xf32>
    %c0_3 = arith.constant 0 : index
    %c0_4 = arith.constant 0 : index
    %2 = vector.load %arg3[%c0_3, %c0_4] : memref<256x128xf32, #tpu.memory_space<vmem>>, vector<256x128xf32>
    %c0_5 = arith.constant 0 : index
    %c0_6 = arith.constant 0 : index
    %3 = vector.load %arg4[%c0_5, %c0_6] : memref<1x128xf32, #tpu.memory_space<vmem>>, vector<1x128xf32>
    %c0_7 = arith.constant 0 : index
    %c0_8 = arith.constant 0 : index
    %4 = vector.load %arg5[%c0_7, %c0_8] : memref<128x128xf32, #tpu.memory_space<vmem>>, vector<128x128xf32>
    %c0_9 = arith.constant 0 : index
    %c0_10 = arith.constant 0 : index
    %5 = vector.load %arg6[%c0_9, %c0_10] : memref<1x128xf32, #tpu.memory_space<vmem>>, vector<1x128xf32>
    %c0_11 = arith.constant 0 : index
    %c0_12 = arith.constant 0 : index
    %6 = vector.load %arg7[%c0_11, %c0_12] : memref<1x128xf32, #tpu.memory_space<vmem>>, vector<1x128xf32>
    %c0_13 = arith.constant 0 : index
    %c0_14 = arith.constant 0 : index
    %7 = vector.load %arg8[%c0_13, %c0_14] : memref<1x128xf32, #tpu.memory_space<vmem>>, vector<1x128xf32>
    %c0_15 = arith.constant 0 : index
    %c0_16 = arith.constant 0 : index
    %8 = vector.load %arg9[%c0_15, %c0_16] : memref<128x128xf32, #tpu.memory_space<vmem>>, vector<128x128xf32>
    %c0_17 = arith.constant 0 : index
    %c0_18 = arith.constant 0 : index
    %9 = vector.load %arg10[%c0_17, %c0_18] : memref<1x128xf32, #tpu.memory_space<vmem>>, vector<1x128xf32>
    %cst = arith.constant dense<0.000000e+00> : vector<8x128xf32>
    %10 = tpu.matmul %0, %2, %cst {dimension_numbers = #tpu.dot_dimension_numbers<[1], [0], [0], [1], [0, 0, 1, 1], [], []>} : vector<8x256xf32>, vector<256x128xf32>, vector<8x128xf32> -> vector<8x128xf32>
    %11 = vector.broadcast %3 : vector<1x128xf32> to vector<8x128xf32>
    %12 = arith.addf %10, %11 : vector<8x128xf32>
    %cst_19 = arith.constant dense<0.000000e+00> : vector<8x128xf32>
    %13 = tpu.matmul %1, %2, %cst_19 {dimension_numbers = #tpu.dot_dimension_numbers<[1], [0], [0], [1], [0, 0, 1, 1], [], []>} : vector<8x256xf32>, vector<256x128xf32>, vector<8x128xf32> -> vector<8x128xf32>
    %14 = vector.broadcast %3 : vector<1x128xf32> to vector<8x128xf32>
    %15 = arith.addf %13, %14 : vector<8x128xf32>
    %cst_20 = arith.constant dense<0.000000e+00> : vector<8x128xf32>
    %16 = tpu.matmul %12, %4, %cst_20 {dimension_numbers = #tpu.dot_dimension_numbers<[1], [0], [0], [1], [0, 0, 1, 1], [], []>} : vector<8x128xf32>, vector<128x128xf32>, vector<8x128xf32> -> vector<8x128xf32>
    %17 = vector.broadcast %5 : vector<1x128xf32> to vector<8x128xf32>
    %18 = arith.addf %16, %17 : vector<8x128xf32>
    %cst_21 = arith.constant dense<0.000000e+00> : vector<128xf32>
    %19 = vector.multi_reduction <add>, %18, %cst_21 [0] : vector<8x128xf32> to vector<128xf32>
    %20 = vector.shape_cast %19 : vector<128xf32> to vector<1x128xf32>
    %cst_22 = arith.constant 8.000000e+00 : f32
    %21 = vector.broadcast %cst_22 : f32 to vector<1x128xf32>
    %22 = arith.divf %20, %21 : vector<1x128xf32>
    %23 = vector.broadcast %22 : vector<1x128xf32> to vector<8x128xf32>
    %24 = arith.subf %18, %23 : vector<8x128xf32>
    %25 = arith.mulf %24, %24 : vector<8x128xf32>
    %cst_23 = arith.constant dense<0.000000e+00> : vector<128xf32>
    %26 = vector.multi_reduction <add>, %25, %cst_23 [0] : vector<8x128xf32> to vector<128xf32>
    %27 = vector.shape_cast %26 : vector<128xf32> to vector<1x128xf32>
    %cst_24 = arith.constant 8.000000e+00 : f32
    %28 = vector.broadcast %cst_24 : f32 to vector<1x128xf32>
    %29 = arith.divf %27, %28 : vector<1x128xf32>
    %cst_25 = arith.constant 9.99999974E-6 : f32
    %30 = vector.broadcast %cst_25 : f32 to vector<1x128xf32>
    %31 = arith.addf %29, %30 : vector<1x128xf32>
    %32 = math.rsqrt %31 : vector<1x128xf32>
    %33 = vector.broadcast %32 : vector<1x128xf32> to vector<8x128xf32>
    %34 = arith.mulf %24, %33 : vector<8x128xf32>
    %35 = vector.broadcast %6 : vector<1x128xf32> to vector<8x128xf32>
    %36 = arith.mulf %34, %35 : vector<8x128xf32>
    %37 = vector.broadcast %7 : vector<1x128xf32> to vector<8x128xf32>
    %38 = arith.addf %36, %37 : vector<8x128xf32>
    %cst_26 = arith.constant 0.000000e+00 : f32
    %39 = vector.broadcast %cst_26 : f32 to vector<8x128xf32>
    %40 = arith.maximumf %38, %39 : vector<8x128xf32>
    %cst_27 = arith.constant dense<0.000000e+00> : vector<8x128xf32>
    %41 = tpu.matmul %40, %8, %cst_27 {dimension_numbers = #tpu.dot_dimension_numbers<[1], [0], [0], [1], [0, 0, 1, 1], [], []>} : vector<8x128xf32>, vector<128x128xf32>, vector<8x128xf32> -> vector<8x128xf32>
    %42 = vector.broadcast %9 : vector<1x128xf32> to vector<8x128xf32>
    %43 = arith.addf %41, %42 : vector<8x128xf32>
    %cst_28 = arith.constant dense<0.000000e+00> : vector<8x128xf32>
    %44 = tpu.matmul %15, %4, %cst_28 {dimension_numbers = #tpu.dot_dimension_numbers<[1], [0], [0], [1], [0, 0, 1, 1], [], []>} : vector<8x128xf32>, vector<128x128xf32>, vector<8x128xf32> -> vector<8x128xf32>
    %45 = vector.broadcast %5 : vector<1x128xf32> to vector<8x128xf32>
    %46 = arith.addf %44, %45 : vector<8x128xf32>
    %cst_29 = arith.constant dense<0.000000e+00> : vector<128xf32>
    %47 = vector.multi_reduction <add>, %46, %cst_29 [0] : vector<8x128xf32> to vector<128xf32>
    %48 = vector.shape_cast %47 : vector<128xf32> to vector<1x128xf32>
    %cst_30 = arith.constant 8.000000e+00 : f32
    %49 = vector.broadcast %cst_30 : f32 to vector<1x128xf32>
    %50 = arith.divf %48, %49 : vector<1x128xf32>
    %51 = vector.broadcast %50 : vector<1x128xf32> to vector<8x128xf32>
    %52 = arith.subf %46, %51 : vector<8x128xf32>
    %53 = arith.mulf %52, %52 : vector<8x128xf32>
    %cst_31 = arith.constant dense<0.000000e+00> : vector<128xf32>
    %54 = vector.multi_reduction <add>, %53, %cst_31 [0] : vector<8x128xf32> to vector<128xf32>
    %55 = vector.shape_cast %54 : vector<128xf32> to vector<1x128xf32>
    %cst_32 = arith.constant 8.000000e+00 : f32
    %56 = vector.broadcast %cst_32 : f32 to vector<1x128xf32>
    %57 = arith.divf %55, %56 : vector<1x128xf32>
    %cst_33 = arith.constant 9.99999974E-6 : f32
    %58 = vector.broadcast %cst_33 : f32 to vector<1x128xf32>
    %59 = arith.addf %57, %58 : vector<1x128xf32>
    %60 = math.rsqrt %59 : vector<1x128xf32>
    %61 = vector.broadcast %60 : vector<1x128xf32> to vector<8x128xf32>
    %62 = arith.mulf %52, %61 : vector<8x128xf32>
    %63 = vector.broadcast %6 : vector<1x128xf32> to vector<8x128xf32>
    %64 = arith.mulf %62, %63 : vector<8x128xf32>
    %65 = vector.broadcast %7 : vector<1x128xf32> to vector<8x128xf32>
    %66 = arith.addf %64, %65 : vector<8x128xf32>
    %cst_34 = arith.constant 0.000000e+00 : f32
    %67 = vector.broadcast %cst_34 : f32 to vector<8x128xf32>
    %68 = arith.maximumf %66, %67 : vector<8x128xf32>
    %cst_35 = arith.constant dense<0.000000e+00> : vector<8x128xf32>
    %69 = tpu.matmul %68, %8, %cst_35 {dimension_numbers = #tpu.dot_dimension_numbers<[1], [0], [0], [1], [0, 0, 1, 1], [], []>} : vector<8x128xf32>, vector<128x128xf32>, vector<8x128xf32> -> vector<8x128xf32>
    %70 = vector.broadcast %9 : vector<1x128xf32> to vector<8x128xf32>
    %71 = arith.addf %69, %70 : vector<8x128xf32>
    %72 = arith.mulf %43, %43 : vector<8x128xf32>
    %cst_36 = arith.constant dense<0.000000e+00> : vector<8xf32>
    %73 = vector.multi_reduction <add>, %72, %cst_36 [1] : vector<8x128xf32> to vector<8xf32>
    %74 = vector.shape_cast %73 : vector<8xf32> to vector<8x1xf32>
    %75 = math.rsqrt %74 : vector<8x1xf32>
    %cst_37 = arith.constant 1.000000e-24 : f32
    %76 = vector.broadcast %cst_37 : f32 to vector<8x1xf32>
    %77 = arith.cmpf ogt, %74, %76 : vector<8x1xf32>
    %78 = vector.broadcast %75 : vector<8x1xf32> to vector<8x128xf32>
    %79 = arith.mulf %43, %78 : vector<8x128xf32>
    %cst_38 = arith.constant 9.99999995E+11 : f32
    %80 = vector.broadcast %cst_38 : f32 to vector<8x128xf32>
    %81 = arith.mulf %43, %80 : vector<8x128xf32>
    %82 = vector.shape_cast %77 : vector<8x1xi1> to vector<8x1xi1>
    %83 = vector.broadcast %82 : vector<8x1xi1> to vector<8x128xi1>
    %84 = arith.select %83, %79, %81 : vector<8x128xi1>, vector<8x128xf32>
    %c0_39 = arith.constant 0 : index
    %c0_40 = arith.constant 0 : index
    %85 = vector.load %arg13[%c0_39, %c0_40] : memref<16x128xf32, #tpu.memory_space<vmem>>, vector<8x128xf32>
    tpu.vector_store %arg13[%c0_39, %c0_40], %84 {strides = array<i32>} : memref<16x128xf32, #tpu.memory_space<vmem>>, vector<8x128xf32>,
    %86 = arith.mulf %71, %71 : vector<8x128xf32>
    %cst_41 = arith.constant dense<0.000000e+00> : vector<8xf32>
    %87 = vector.multi_reduction <add>, %86, %cst_41 [1] : vector<8x128xf32> to vector<8xf32>
    %88 = vector.shape_cast %87 : vector<8xf32> to vector<8x1xf32>
    %89 = math.rsqrt %88 : vector<8x1xf32>
    %cst_42 = arith.constant 1.000000e-24 : f32
    %90 = vector.broadcast %cst_42 : f32 to vector<8x1xf32>
    %91 = arith.cmpf ogt, %88, %90 : vector<8x1xf32>
    %92 = vector.broadcast %89 : vector<8x1xf32> to vector<8x128xf32>
    %93 = arith.mulf %71, %92 : vector<8x128xf32>
    %cst_43 = arith.constant 9.99999995E+11 : f32
    %94 = vector.broadcast %cst_43 : f32 to vector<8x128xf32>
    %95 = arith.mulf %71, %94 : vector<8x128xf32>
    %96 = vector.shape_cast %91 : vector<8x1xi1> to vector<8x1xi1>
    %97 = vector.broadcast %96 : vector<8x1xi1> to vector<8x128xi1>
    %98 = arith.select %97, %93, %95 : vector<8x128xi1>, vector<8x128xf32>
    %c8 = arith.constant 8 : index
    %c0_44 = arith.constant 0 : index
    %99 = vector.load %arg13[%c8, %c0_44] : memref<16x128xf32, #tpu.memory_space<vmem>>, vector<8x128xf32>
    tpu.vector_store %arg13[%c8, %c0_44], %98 {strides = array<i32>} : memref<16x128xf32, #tpu.memory_space<vmem>>, vector<8x128xf32>,
    %c0_45 = arith.constant 0 : index
    %100 = memref.load %arg0[%c0_45] : memref<1xf32, #tpu.memory_space<smem>>
    %c0_46 = arith.constant 0 : index
    %c0_47 = arith.constant 0 : index
    %101 = vector.load %arg11[%c0_46, %c0_47] : memref<256x128xf32, #tpu.memory_space<vmem>>, vector<256x128xf32>
    %102 = vector.broadcast %100 : f32 to vector<256x128xf32>
    %103 = arith.mulf %101, %102 : vector<256x128xf32>
    %cst_48 = arith.constant 1.000000e+00 : f32
    %104 = arith.subf %cst_48, %100 : f32
    %105 = vector.broadcast %104 : f32 to vector<256x128xf32>
    %106 = arith.mulf %2, %105 : vector<256x128xf32>
    %107 = arith.addf %103, %106 : vector<256x128xf32>
    %c0_49 = arith.constant 0 : index
    %c0_50 = arith.constant 0 : index
    %108 = vector.load %arg12[%c0_49, %c0_50] : memref<1x128xf32, #tpu.memory_space<vmem>>, vector<1x128xf32>
    %109 = vector.broadcast %100 : f32 to vector<1x128xf32>
    %110 = arith.mulf %108, %109 : vector<1x128xf32>
    %cst_51 = arith.constant 1.000000e+00 : f32
    %111 = arith.subf %cst_51, %100 : f32
    %112 = vector.broadcast %111 : f32 to vector<1x128xf32>
    %113 = arith.mulf %3, %112 : vector<1x128xf32>
    %114 = arith.addf %110, %113 : vector<1x128xf32>
    %c0_52 = arith.constant 0 : index
    %c0_53 = arith.constant 0 : index
    %115 = vector.load %arg15[%c0_52, %c0_53] : memref<256x128xf32, #tpu.memory_space<vmem>>, vector<256x128xf32>
    tpu.vector_store %arg15[%c0_52, %c0_53], %107 {strides = array<i32>} : memref<256x128xf32, #tpu.memory_space<vmem>>, vector<256x128xf32>,
    %c0_54 = arith.constant 0 : index
    %c0_55 = arith.constant 0 : index
    %116 = vector.load %arg16[%c0_54, %c0_55] : memref<1x128xf32, #tpu.memory_space<vmem>>, vector<1x128xf32>
    tpu.vector_store %arg16[%c0_54, %c0_55], %114 {strides = array<i32>} : memref<1x128xf32, #tpu.memory_space<vmem>>, vector<1x128xf32>,
    %cst_56 = arith.constant dense<0.000000e+00> : vector<8x128xf32>
    %117 = tpu.matmul %1, %107, %cst_56 {dimension_numbers = #tpu.dot_dimension_numbers<[1], [0], [0], [1], [0, 0, 1, 1], [], []>} : vector<8x256xf32>, vector<256x128xf32>, vector<8x128xf32> -> vector<8x128xf32>
    %118 = vector.broadcast %114 : vector<1x128xf32> to vector<8x128xf32>
    %119 = arith.addf %117, %118 : vector<8x128xf32>
    %cst_57 = arith.constant dense<0.000000e+00> : vector<8x128xf32>
    %120 = tpu.matmul %0, %107, %cst_57 {dimension_numbers = #tpu.dot_dimension_numbers<[1], [0], [0], [1], [0, 0, 1, 1], [], []>} : vector<8x256xf32>, vector<256x128xf32>, vector<8x128xf32> -> vector<8x128xf32>
    %121 = vector.broadcast %114 : vector<1x128xf32> to vector<8x128xf32>
    %122 = arith.addf %120, %121 : vector<8x128xf32>
    %123 = arith.mulf %119, %119 : vector<8x128xf32>
    %cst_58 = arith.constant dense<0.000000e+00> : vector<8xf32>
    %124 = vector.multi_reduction <add>, %123, %cst_58 [1] : vector<8x128xf32> to vector<8xf32>
    %125 = vector.shape_cast %124 : vector<8xf32> to vector<8x1xf32>
    %126 = math.rsqrt %125 : vector<8x1xf32>
    %cst_59 = arith.constant 1.000000e-24 : f32
    %127 = vector.broadcast %cst_59 : f32 to vector<8x1xf32>
    %128 = arith.cmpf ogt, %125, %127 : vector<8x1xf32>
    %129 = vector.broadcast %126 : vector<8x1xf32> to vector<8x128xf32>
    %130 = arith.mulf %119, %129 : vector<8x128xf32>
    %cst_60 = arith.constant 9.99999995E+11 : f32
    %131 = vector.broadcast %cst_60 : f32 to vector<8x128xf32>
    %132 = arith.mulf %119, %131 : vector<8x128xf32>
    %133 = vector.shape_cast %128 : vector<8x1xi1> to vector<8x1xi1>
    %134 = vector.broadcast %133 : vector<8x1xi1> to vector<8x128xi1>
    %135 = arith.select %134, %130, %132 : vector<8x128xi1>, vector<8x128xf32>
    %c0_61 = arith.constant 0 : index
    %c0_62 = arith.constant 0 : index
    %136 = vector.load %arg14[%c0_61, %c0_62] : memref<16x128xf32, #tpu.memory_space<vmem>>, vector<8x128xf32>
    tpu.vector_store %arg14[%c0_61, %c0_62], %135 {strides = array<i32>} : memref<16x128xf32, #tpu.memory_space<vmem>>, vector<8x128xf32>,
    %137 = arith.mulf %122, %122 : vector<8x128xf32>
    %cst_63 = arith.constant dense<0.000000e+00> : vector<8xf32>
    %138 = vector.multi_reduction <add>, %137, %cst_63 [1] : vector<8x128xf32> to vector<8xf32>
    %139 = vector.shape_cast %138 : vector<8xf32> to vector<8x1xf32>
    %140 = math.rsqrt %139 : vector<8x1xf32>
    %cst_64 = arith.constant 1.000000e-24 : f32
    %141 = vector.broadcast %cst_64 : f32 to vector<8x1xf32>
    %142 = arith.cmpf ogt, %139, %141 : vector<8x1xf32>
    %143 = vector.broadcast %140 : vector<8x1xf32> to vector<8x128xf32>
    %144 = arith.mulf %122, %143 : vector<8x128xf32>
    %cst_65 = arith.constant 9.99999995E+11 : f32
    %145 = vector.broadcast %cst_65 : f32 to vector<8x128xf32>
    %146 = arith.mulf %122, %145 : vector<8x128xf32>
    %147 = vector.shape_cast %142 : vector<8x1xi1> to vector<8x1xi1>
    %148 = vector.broadcast %147 : vector<8x1xi1> to vector<8x128xi1>
    %149 = arith.select %148, %144, %146 : vector<8x128xi1>, vector<8x128xf32>
    %c8_66 = arith.constant 8 : index
    %c0_67 = arith.constant 0 : index
    %150 = vector.load %arg14[%c8_66, %c0_67] : memref<16x128xf32, #tpu.memory_space<vmem>>, vector<8x128xf32>
    tpu.vector_store %arg14[%c8_66, %c0_67], %149 {strides = array<i32>} : memref<16x128xf32, #tpu.memory_space<vmem>>, vector<8x128xf32>,
    return
  }
}

</mosaic_0001>

<bundles_post_ra>
// kernel: tpu_custom_call.1
= control target key start
LH: loop header
LB: loop body
LE: loop exit
PB: predicated region body
PF: predicated region fallthrough
CT: control target
= control target key end

     0   :  { %s2640_s0 = inlined_call_operand.<no memory space> [shape: f32[1], index: 0, kind: input, shape index: {}]   ;;  %s2641_s1 = inlined_call_operand.hbm [shape: f32[8,256], index: 1, kind: input, shape index: {}]   ;;  %s2642_s2 = inlined_call_operand.hbm [shape: f32[8,256], index: 2, kind: input, shape index: {}]   ;;  %s2643_s3 = inlined_call_operand.hbm [shape: f32[256,128], index: 3, kind: input, shape index: {}]   ;;  %s2644_s4 = inlined_call_operand.vmem [shape: f32[1,128], index: 4, kind: input, shape index: {}]   ;;  %s2645_s5 = inlined_call_operand.hbm [shape: f32[128,128], index: 5, kind: input, shape index: {}]   ;;  %s2646_s6 = inlined_call_operand.vmem [shape: f32[1,128], index: 6, kind: input, shape index: {}]   ;;  %s2647_s7 = inlined_call_operand.vmem [shape: f32[1,128], index: 7, kind: input, shape index: {}]   ;;  %s2648_s8 = inlined_call_operand.vmem [shape: f32[1,128], index: 8, kind: input, shape index: {}]   ;;  %s2649_s9 = inlined_call_operand.hbm [shape: f32[128,128], index: 9, kind: input, shape index: {}]   ;;  %s2650_s10 = inlined_call_operand.vmem [shape: f32[1,128], index: 10, kind: input, shape index: {}]   ;;  %s2651_s11 = inlined_call_operand.hbm [shape: f32[256,128], index: 11, kind: input, shape index: {}]   ;;  %s2652_s12 = inlined_call_operand.vmem [shape: f32[1,128], index: 12, kind: input, shape index: {}]   ;;  %s2653_s13 = inlined_call_operand.hbm [shape: f32[16,128], index: 13, kind: output, shape index: {0}]   ;;  %s2654_s14 = inlined_call_operand.hbm [shape: f32[16,128], index: 14, kind: output, shape index: {1}]   ;;  %s2655_s15 = inlined_call_operand.hbm [shape: f32[256,128], index: 15, kind: output, shape index: {2}]   ;;  %s2656_s16 = inlined_call_operand.hbm [shape: f32[1,128], index: 16, kind: output, shape index: {3}]  }
   0x1   :  { %2658 = sst [smem:[#allocation27_spill]] %s2640_s0 }
   0x2   :  { %23 = vsyncpa [#allocation4], 0 }
   0x3   :  { %24 = vsyncpa [#allocation7], 0 }
   0x4   :  { %25 = vsyncpa [#allocation10], 0 }
   0x5   :  { %26 = vsyncpa [#allocation13], 0 }
   0x6   :  { %27 = vsyncpa [#allocation5], 0 }
   0x7   :  { %28 = vsyncpa [#allocation16], 0 }
   0x8   :  { %29 = vsyncpa [#allocation19], 0  ;;  %s1959_s21 = smov [#allocation6]   ;;  %s1725_s25 = scalar_lea.hbm %s2642_s2, 256 }
   0x9   :  { %s48_s22 = sshll.u32 %s1959_s21, 4  ;;  %p1726_p0 = scmp.ne.s32.totalorder %s2642_s2, %s1725_s25  ;;  %s49_s22 = int_to_ptr.vmem [resolvable:$true] %s48_s22 }
   0xa   :  { %p1729_p1 = scmp.lt.u32.totalorder %s1725_s25, %s2642_s2 }
   0xc   :  { %p1731_p2 = pnand %p1729_p1, %p1726_p0 }
   0xe   :  { %1734 = shalt.err (!%p1731_p2)
}
   0xf   :  { %s1735_s30 = scalar_lea.vmem %s49_s22, 256  ;;  %p1740_p4 = scmp.lt.s32.totalorder %s49_s22, %s49_s22 }
  0x10   :  { %p1736_p3 = scmp.ne.s32.totalorder %s49_s22, %s1735_s30  ;;  %p1741_p5 = scmp.lt.s32.totalorder %s1735_s30, %s1735_s30 }
  0x12   :  { %p1742_p6 = por %p1741_p5, %p1740_p4 }
  0x14   :  { %p1743_p7 = pnand %p1742_p6, %p1736_p3 }
  0x16   :  { %1746 = shalt.err (!%p1743_p7)
}
  0x17   :  { %51 = dma.hbm_to_vmem [thread:$0]  %s2642_s2, 256, %s49_s22, [#allocation7]  }
  0x18   :  { %s1960_s18 = smov [#allocation9]   ;;  %s1961_s20 = smov [#allocation3]  }
  0x19   :  { %s71_s19 = sshll.u32 %s1960_s18, 4  ;;  %s38_s21 = sshll.u32 %s1961_s20, 4  ;;  %s72_s19 = int_to_ptr.vmem [resolvable:$true] %s71_s19  ;;  %s39_s21 = int_to_ptr.vmem [resolvable:$true] %s38_s21 }
  0x1a   :  { %s1747_s25 = scalar_lea.hbm %s2645_s5, 2048 }
  0x1b   :  { %p1748_p8 = scmp.ne.s32.totalorder %s2645_s5, %s1747_s25  ;;  %p1751_p9 = scmp.lt.u32.totalorder %s1747_s25, %s2645_s5 }
  0x1d   :  { %p1753_p10 = pnand %p1751_p9, %p1748_p8 }
  0x1f   :  { %1756 = shalt.err (!%p1753_p10)
}
  0x20   :  { %s1757_s2 = scalar_lea.vmem %s72_s19, 2048  ;;  %p1762_p12 = scmp.lt.s32.totalorder %s72_s19, %s72_s19 }
  0x21   :  { %p1758_p11 = scmp.ne.s32.totalorder %s72_s19, %s1757_s2  ;;  %p1763_p13 = scmp.lt.s32.totalorder %s1757_s2, %s1757_s2 }
  0x23   :  { %p1764_p0 = por %p1763_p13, %p1762_p12 }
  0x25   :  { %p1765_p1 = pnand %p1764_p0, %p1758_p11 }
  0x27   :  { %1768 = shalt.err (!%p1765_p1)
}
  0x28   :  { %s1962_s22 = smov 128   ;;  %s1963_s30 = smov 8  }
  0x29   :  { %77 = dma.hbm_to_vmem [thread:$0]  %s2645_s5, 2048, %s72_s19, [#allocation10], %s1962_s22, %s1962_s22, %s1963_s30  }
  0x2a   :  { %s1769_s23 = scalar_lea.hbm %s2641_s1, 256 }
  0x2b   :  { %p1770_p2 = scmp.ne.s32.totalorder %s2641_s1, %s1769_s23  ;;  %p1773_p3 = scmp.lt.u32.totalorder %s1769_s23, %s2641_s1 }
  0x2d   :  { %p1775_p4 = pnand %p1773_p3, %p1770_p2 }
  0x2f   :  { %1778 = shalt.err (!%p1775_p4)
}
  0x30   :  { %s1779_s28 = scalar_lea.vmem %s39_s21, 256  ;;  %p1784_p6 = scmp.lt.s32.totalorder %s39_s21, %s39_s21 }
  0x31   :  { %p1780_p5 = scmp.ne.s32.totalorder %s39_s21, %s1779_s28  ;;  %p1785_p7 = scmp.lt.s32.totalorder %s1779_s28, %s1779_s28 }
  0x33   :  { %p1786_p8 = por %p1785_p7, %p1784_p6 }
  0x35   :  { %p1787_p9 = pnand %p1786_p8, %p1780_p5 }
  0x37   :  { %1790 = shalt.err (!%p1787_p9)
}
  0x38   :  { %41 = dma.hbm_to_vmem [thread:$0]  %s2641_s1, 256, %s39_s21, [#allocation4]  }
  0x39   :  { %s1964_s29 = smov [#allocation8]   ;;  %s1965_s0 = smov [#allocation11]  }
  0x3a   :  { %s57_s2 = sshll.u32 %s1964_s29, 4  ;;  %s89_s17 = sshll.u32 %s1965_s0, 4  ;;  %s58_s2 = int_to_ptr.vmem [resolvable:$true] %s57_s2  ;;  %s90_s17 = int_to_ptr.vmem [resolvable:$true] %s89_s17 }
  0x3b   :  { %s1791_s23 = scalar_lea.hbm %s2643_s3, 4096 }
  0x3c   :  { %p1792_p10 = scmp.ne.s32.totalorder %s2643_s3, %s1791_s23  ;;  %p1795_p11 = scmp.lt.u32.totalorder %s1791_s23, %s2643_s3 }
  0x3e   :  { %p1797_p12 = pnand %p1795_p11, %p1792_p10 }
  0x40   :  { %1800 = shalt.err (!%p1797_p12)
}
  0x41   :  { %s1801_s1 = scalar_lea.vmem %s58_s2, 4096  ;;  %p1806_p0 = scmp.lt.s32.totalorder %s58_s2, %s58_s2 }
  0x42   :  { %p1802_p13 = scmp.ne.s32.totalorder %s58_s2, %s1801_s1  ;;  %p1807_p1 = scmp.lt.s32.totalorder %s1801_s1, %s1801_s1 }
  0x44   :  { %p1808_p2 = por %p1807_p1, %p1806_p0 }
  0x46   :  { %p1809_p3 = pnand %p1808_p2, %p1802_p13 }
  0x48   :  { %1812 = shalt.err (!%p1809_p3)
}
  0x49   :  { %63 = dma.hbm_to_vmem [thread:$0]  %s2643_s3, 4096, %s58_s2, [#allocation7], %s1962_s22, %s1962_s22, %s1963_s30  }
  0x4a   :  { %s1813_s29 = scalar_lea.hbm %s2649_s9, 2048 }
  0x4b   :  { %p1814_p4 = scmp.ne.s32.totalorder %s2649_s9, %s1813_s29  ;;  %p1817_p5 = scmp.lt.u32.totalorder %s1813_s29, %s2649_s9 }
  0x4d   :  { %p1819_p6 = pnand %p1817_p5, %p1814_p4 }
  0x4f   :  { %1822 = shalt.err (!%p1819_p6)
}
  0x50   :  { %s1823_s24 = scalar_lea.vmem %s90_s17, 2048  ;;  %p1828_p8 = scmp.lt.s32.totalorder %s90_s17, %s90_s17 }
  0x51   :  { %p1824_p7 = scmp.ne.s32.totalorder %s90_s17, %s1823_s24  ;;  %p1829_p9 = scmp.lt.s32.totalorder %s1823_s24, %s1823_s24 }
  0x53   :  { %p1830_p10 = por %p1829_p9, %p1828_p8 }
  0x55   :  { %p1831_p11 = pnand %p1830_p10, %p1824_p7 }
  0x57   :  { %1834 = shalt.err (!%p1831_p11)
}
  0x58   :  { %95 = dma.hbm_to_vmem [thread:$0]  %s2649_s9, 2048, %s90_s17, [#allocation10], %s1962_s22, %s1962_s22, %s1963_s30  }
  0x59   :  { %s1966_s25 = smov [#allocation12]   ;;  %s1835_s21 = scalar_lea.hbm %s2651_s11, 4096 }
  0x5a   :  { %s103_s26 = sshll.u32 %s1966_s25, 4  ;;  %p1836_p12 = scmp.ne.s32.totalorder %s2651_s11, %s1835_s21  ;;  %s104_s26 = int_to_ptr.vmem [resolvable:$true] %s103_s26 }
  0x5b   :  { %p1839_p13 = scmp.lt.u32.totalorder %s1835_s21, %s2651_s11 }
  0x5d   :  { %p1841_p0 = pnand %p1839_p13, %p1836_p12 }
  0x5f   :  { %1844 = shalt.err (!%p1841_p0)
}
  0x60   :  { %s1845_s0 = scalar_lea.vmem %s104_s26, 4096  ;;  %p1850_p2 = scmp.lt.s32.totalorder %s104_s26, %s104_s26 }
  0x61   :  { %p1846_p1 = scmp.ne.s32.totalorder %s104_s26, %s1845_s0  ;;  %p1851_p3 = scmp.lt.s32.totalorder %s1845_s0, %s1845_s0 }
  0x63   :  { %p1852_p4 = por %p1851_p3, %p1850_p2 }
  0x65   :  { %p1853_p5 = pnand %p1852_p4, %p1846_p1 }
  0x67   :  { %1856 = shalt.err (!%p1853_p5)
}
  0x68   :  { %109 = dma.hbm_to_vmem [thread:$0]  %s2651_s11, 4096, %s104_s26, [#allocation13], %s1962_s22, %s1962_s22, %s1963_s30  }
  0x69   :  { %1945 = dma.done.wait [#allocation4], 256  }
  0x6a   :  { %1946 = vsyncadd [#allocation4], 4294967040 }
  0x6b   :  { %1947 = dma.done.wait [#allocation7], 4352  }
  0x6c   :  { %1948 = vsyncadd [#allocation7], 4294962944 }
  0x6d   :  { %1949 = dma.done.wait [#allocation10], 4096  }
  0x6e   :  { %1950 = vsyncadd [#allocation10], 4294963200 }
  0x6f   :  { %1951 = dma.done.wait [#allocation13], 4096  }
  0x70   :  { %1952 = vsyncadd [#allocation13], 4294963200  ;;  %s2659_s23 = sld [smem:[#allocation27_spill]]  ;;  %v150_v2 = vld [vmem:[#allocation8 + $0x80] sm:$0xff]  ;;  %v151_v3 = vld [vmem:[#allocation8 + $0x88] sm:$0xff]  ;;  %vm1968_vm0 = vmmov 0  }
  0x71   :  { %v737_v4 = vld [vmem:[#allocation12 + $0x80] sm:$0xff]  ;;  %v1474_v5 = vpack.c.bf16 %v151_v3, %v150_v2  ;;  %v738_v6 = vld [vmem:[#allocation12 + $0x88] sm:$0xff]  ;;  %v2159_v18 = vld [vmem:[#allocation8 + $0x90] sm:$0xff]  ;;  %s1970_s5 = smov [#allocation18]  }
  0x72   :  { %v134_v10 = vld [vmem:[#allocation8] sm:$0xff]  ;;  %v135_v11 = vld [vmem:[#allocation8 + $0x8] sm:$0xff]  ;;  %v2165_v22 = vld [vmem:[#allocation8 + $0x98] sm:$0xff]  ;;  %s1099_s19 = sshll.u32 %s1970_s5, 4  ;;  %s1100_s19 = int_to_ptr.vmem [resolvable:$true] %s1099_s19 }
  0x73   :  { %v1476_v13 = vpack.c.bf16 %v135_v11, %v134_v10  ;;  %v721_v14 = vld [vmem:[#allocation12] sm:$0xff]  ;;  %v722_v15 = vld [vmem:[#allocation12 + $0x8] sm:$0xff]  ;;  %1475 = vmatprep.subr.bf16.mxu0 %v1474_v5  ;;  %v136_v23 = vld [vmem:[#allocation8 + $0x10] sm:$0xff]  ;;  %v1478_v26 = vpack.c.bf16 %v2165_v22, %v2159_v18  ;;  %1507 = vmatprep.subr.bf16.mxu1 %v1474_v5  ;;  %s1861_s29 = scalar_lea.vmem %s1100_s19, 32  ;;  %p1862_p7 = scmp.lt.s32.totalorder %s1100_s19, %s1100_s19 }
  0x74   :  { %v137_v24 = vld [vmem:[#allocation8 + $0x18] sm:$0xff]  ;;  %v723_v28 = vld [vmem:[#allocation12 + $0x10] sm:$0xff]  ;;  %v2171_v30 = vld [vmem:[#allocation8 + $0xa0] sm:$0xff] }
  0x75   :  { %1477 = vmatpush3.bf16.msra.mxu0 %v1476_v13  ;;  %v1480_v27 = vpack.c.bf16 %v137_v24, %v136_v23  ;;  %v724_v29 = vld [vmem:[#allocation12 + $0x18] sm:$0xff]  ;;  %v2180_v35 = vld [vmem:[#allocation8 + $0xa8] sm:$0xff]  ;;  %v138_v36 = vld [vmem:[#allocation8 + $0x20] sm:$0xff]  ;;  %1509 = vmatpush3.bf16.msra.mxu1 %v1476_v13 }
  0x76   :  { %s786_s24 = ssub.f32 1.0, %s2659_s23  ;;  %v2149_v0 = vstv %s2659_s23  ;;  %v139_v37 = vld [vmem:[#allocation8 + $0x28] sm:$0xff]  ;;  %1479 = vmatprep.subr.bf16.mxu0 %v1478_v26  ;;  %v1482_v40 = vpack.c.bf16 %v2180_v35, %v2171_v30  ;;  %v725_v41 = vld [vmem:[#allocation12 + $0x20] sm:$0xff]  ;;  %v2187_v43 = vld [vmem:[#allocation8 + $0xb0] sm:$0xff]  ;;  %1511 = vmatprep.subr.bf16.mxu1 %v1478_v26 }
  0x77   :  { %v770_v7 = vmul.f32 %v2149_v0, %v737_v4  ;;  %v771_v12 = vmul.f32 %v2149_v0, %v738_v6  ;;  %v754_v20 = vmul.f32 %v2149_v0, %v721_v14  ;;  %v755_v21 = vmul.f32 %v2149_v0, %v722_v15  ;;  %v726_v42 = vld [vmem:[#allocation12 + $0x28] sm:$0xff]  ;;  %v2193_v47 = vld [vmem:[#allocation8 + $0xb8] sm:$0xff]  ;;  %v140_v52 = vld [vmem:[#allocation8 + $0x30] sm:$0xff] }
  0x78   :  { %v2151_v1 = vstv %s786_s24  ;;  %v756_v33 = vmul.f32 %v2149_v0, %v723_v28  ;;  %v757_v34 = vmul.f32 %v2149_v0, %v724_v29  ;;  %v1484_v44 = vpack.c.bf16 %v139_v37, %v138_v36  ;;  %v727_v53 = vld [vmem:[#allocation12 + $0x30] sm:$0xff]  ;;  %v728_v54 = vld [vmem:[#allocation12 + $0x38] sm:$0xff]  ;;  %v2205_v57 = vld [vmem:[#allocation8 + $0xc0] sm:$0xff] }
  0x79   :  { %v804_v8 = vmul.f32 %v2151_v1, %v150_v2  ;;  %v805_v9 = vmul.f32 %v2151_v1, %v151_v3  ;;  %v788_v16 = vmul.f32 %v2151_v1, %v134_v10  ;;  %v789_v17 = vmul.f32 %v2151_v1, %v135_v11  ;;  %1481 = vmatpush3.bf16.msra.mxu0 %v1480_v27  ;;  %v141_v56 = vld [vmem:[#allocation8 + $0x38] sm:$0xff]  ;;  %v2207_v58 = vld [vmem:[#allocation8 + $0xc8] sm:$0xff]  ;;  %v729_v63 = vld [vmem:[#allocation12 + $0x40] sm:$0xff] }
  0x7a   :  { %v790_v38 = vmul.f32 %v2151_v1, %v136_v23  ;;  %v791_v39 = vmul.f32 %v2151_v1, %v137_v24  ;;  %v758_v45 = vmul.f32 %v2149_v0, %v725_v41  ;;  %v759_v46 = vmul.f32 %v2149_v0, %v726_v42  ;;  %1483 = vmatprep.subr.bf16.mxu0 %v1482_v40  ;;  %v730_v2 = vld [vmem:[#allocation12 + $0x48] sm:$0xff]  ;;  %v142_v5 = vld [vmem:[#allocation8 + $0x40] sm:$0xff]  ;;  %v731_v11 = vld [vmem:[#allocation12 + $0x50] sm:$0xff] }
  0x7b   :  { %v2161_v19 = vadd.f32 %v804_v8, %v770_v7  ;;  %v2167_v25 = vadd.f32 %v805_v9, %v771_v12  ;;  %v2174_v31 = vadd.f32 %v788_v16, %v754_v20  ;;  %v2176_v32 = vadd.f32 %v789_v17, %v755_v21  ;;  %1513 = vmatpush3.bf16.msra.mxu1 %v1480_v27  ;;  %v143_v8 = vld [vmem:[#allocation8 + $0x48] sm:$0xff]  ;;  %v732_v12 = vld [vmem:[#allocation12 + $0x58] sm:$0xff]  ;;  %v2236_v17 = vld [vmem:[#allocation8 + $0xd0] sm:$0xff] }
  0x7c   :  { %v2195_v48 = vadd.f32 %v790_v38, %v756_v33  ;;  %v2197_v49 = vadd.f32 %v791_v39, %v757_v34  ;;  %v792_v50 = vmul.f32 %v2151_v1, %v138_v36  ;;  %v793_v51 = vmul.f32 %v2151_v1, %v139_v37  ;;  %v2238_v20 = vld [vmem:[#allocation8 + $0xd8] sm:$0xff]  ;;  %v733_v21 = vld [vmem:[#allocation12 + $0x60] sm:$0xff]  ;;  %v734_v23 = vld [vmem:[#allocation12 + $0x68] sm:$0xff]  ;;  %1515 = vmatprep.subr.bf16.mxu1 %v1482_v40 }
  0x7d   :  { %872 = vst [vmem:[#allocation17 + $0x80] sm:$0xff] %v2161_v19  ;;  %873 = vst [vmem:[#allocation17 + $0x88] sm:$0xff] %v2167_v25  ;;  %v2203_v55 = vpack.c.bf16 %v2193_v47, %v2187_v43  ;;  %v760_v61 = vmul.f32 %v2149_v0, %v727_v53  ;;  %v761_v62 = vmul.f32 %v2149_v0, %v728_v54  ;;  %1485 = vmatpush3.bf16.msra.mxu0 %v1484_v44  ;;  %v144_v27 = vld [vmem:[#allocation8 + $0x50] sm:$0xff]  ;;  %v145_v28 = vld [vmem:[#allocation8 + $0x58] sm:$0xff] }
  0x7e   :  { %856 = vst [vmem:[#allocation17] sm:$0xff] %v2174_v31  ;;  %857 = vst [vmem:[#allocation17 + $0x8] sm:$0xff] %v2176_v32  ;;  %v2211_v59 = vadd.f32 %v792_v50, %v758_v45  ;;  %v2213_v60 = vadd.f32 %v793_v51, %v759_v46  ;;  %v794_v3 = vmul.f32 %v2151_v1, %v140_v52  ;;  %v146_v38 = vld [vmem:[#allocation8 + $0x60] sm:$0xff]  ;;  %v2251_v39 = vld [vmem:[#allocation3 + $0x8] sm:$0xff] }
  0x7f   :  { %858 = vst [vmem:[#allocation17 + $0x10] sm:$0xff] %v2195_v48  ;;  %859 = vst [vmem:[#allocation17 + $0x18] sm:$0xff] %v2197_v49  ;;  %v795_v4 = vmul.f32 %v2151_v1, %v141_v56  ;;  %v2221_v6 = vpack.c.bf16 %v141_v56, %v140_v52  ;;  %v2225_v7 = vpack.c.bf16 %v2207_v58, %v2205_v57  ;;  %1487 = vmatprep.subr.bf16.mxu0 %v2203_v55  ;;  %v147_v41 = vld [vmem:[#allocation8 + $0x68] sm:$0xff]  ;;  %v735_v45 = vld [vmem:[#allocation12 + $0x70] sm:$0xff] }
  0x80   :  { %860 = vst [vmem:[#allocation17 + $0x20] sm:$0xff] %v2211_v59  ;;  %861 = vst [vmem:[#allocation17 + $0x28] sm:$0xff] %v2213_v60  ;;  %v762_v9 = vmul.f32 %v2149_v0, %v729_v63  ;;  %v763_v10 = vmul.f32 %v2149_v0, %v730_v2  ;;  %v2230_v13 = vadd.f32 %v794_v3, %v760_v61  ;;  %1517 = vmatpush3.bf16.msra.mxu1 %v1484_v44  ;;  %v736_v46 = vld [vmem:[#allocation12 + $0x78] sm:$0xff]  ;;  %v2264_v52 = vld [vmem:[#allocation8 + $0xe0] sm:$0xff] }
  0x81   :  { %v2232_v14 = vadd.f32 %v795_v4, %v761_v62  ;;  %v796_v15 = vmul.f32 %v2151_v1, %v142_v5  ;;  %v797_v16 = vmul.f32 %v2151_v1, %v143_v8  ;;  %v764_v29 = vmul.f32 %v2149_v0, %v731_v11  ;;  %1489 = vmatpush3.bf16.msra.mxu0 %v2221_v6  ;;  %v2266_v53 = vld [vmem:[#allocation8 + $0xe8] sm:$0xff]  ;;  %v2272_v62 = vld [vmem:[#allocation6 + $0x8] sm:$0xff]  ;;  %v148_v3 = vld [vmem:[#allocation8 + $0x70] sm:$0xff] }
  0x82   :  { %862 = vst [vmem:[#allocation17 + $0x30] sm:$0xff] %v2230_v13  ;;  %v765_v33 = vmul.f32 %v2149_v0, %v732_v12  ;;  %v1492_v34 = vpack.c.bf16 %v143_v8, %v142_v5  ;;  %v798_v36 = vmul.f32 %v2151_v1, %v144_v27  ;;  %v799_v37 = vmul.f32 %v2151_v1, %v145_v28  ;;  %v149_v4 = vld [vmem:[#allocation8 + $0x78] sm:$0xff]  ;;  %v2289_v11 = vld [vmem:[#allocation8 + $0xf0] sm:$0xff] }
  0x83   :  { %863 = vst [vmem:[#allocation17 + $0x38] sm:$0xff] %v2232_v14  ;;  %v2242_v24 = vadd.f32 %v796_v15, %v762_v9  ;;  %v2244_v26 = vadd.f32 %v797_v16, %v763_v10  ;;  %1491 = vmatprep.subr.bf16.mxu0 %v2225_v7  ;;  %v1494_v40 = vpack.c.bf16 %v2238_v20, %v2236_v17  ;;  %v2291_v12 = vld [vmem:[#allocation8 + $0xf8] sm:$0xff] }
  0x84   :  { %v766_v42 = vmul.f32 %v2149_v0, %v733_v21  ;;  %v767_v44 = vmul.f32 %v2149_v0, %v734_v23  ;;  %v2260_v50 = vadd.f32 %v798_v36, %v764_v29  ;;  %v2262_v51 = vadd.f32 %v799_v37, %v765_v33  ;;  %273 = vmatprep.mubr.f32.mxu0 %v2251_v39  ;;  %v167_v23 = vld [vmem:[#allocation9] sm:$0xff]  ;;  %v169_v36 = vld [vmem:[#allocation9 + $0x10] sm:$0xff]  ;;  %v170_v37 = vld [vmem:[#allocation9 + $0x18] sm:$0xff] }
  0x85   :  { %864 = vst [vmem:[#allocation17 + $0x40] sm:$0xff] %v2242_v24  ;;  %865 = vst [vmem:[#allocation17 + $0x48] sm:$0xff] %v2244_v26  ;;  %v800_v54 = vmul.f32 %v2151_v1, %v146_v38  ;;  %v801_v56 = vmul.f32 %v2151_v1, %v147_v41  ;;  %v1496_v61 = vpack.c.bf16 %v145_v28, %v144_v27  ;;  %1519 = vmatprep.subr.bf16.mxu1 %v2203_v55  ;;  %v168_v27 = vld [vmem:[#allocation9 + $0x8] sm:$0xff]  ;;  %v2303_v28 = vld [vmem:[#allocation3] sm:$0xff]  ;;  %v1967_v33 = vmov 0.0|0.0  }
  0x86   :  { %1493 = vmatpush3.bf16.msra.mxu0 %v1492_v34  ;;  %866 = vst [vmem:[#allocation17 + $0x50] sm:$0xff] %v2260_v50  ;;  %867 = vst [vmem:[#allocation17 + $0x58] sm:$0xff] %v2262_v51  ;;  %v768_v5 = vmul.f32 %v2149_v0, %v735_v45  ;;  %v769_v8 = vmul.f32 %v2149_v0, %v736_v46  ;;  %v1498_v55 = vpack.c.bf16 %v2266_v53, %v2264_v52  ;;  %v174_v45 = vld [vmem:[#allocation9 + $0x38] sm:$0xff] }
  0x87   :  { %v2276_v63 = vadd.f32 %v800_v54, %v766_v42  ;;  %v2278_v2 = vadd.f32 %v801_v56, %v767_v44  ;;  %1495 = vmatprep.subr.bf16.mxu0 %v1494_v40  ;;  %v802_v9 = vmul.f32 %v2151_v1, %v148_v3  ;;  %v803_v10 = vmul.f32 %v2151_v1, %v149_v4  ;;  %v173_v44 = vld [vmem:[#allocation9 + $0x30] sm:$0xff]  ;;  %v175_v54 = vld [vmem:[#allocation9 + $0x40] sm:$0xff]  ;;  %v176_v56 = vld [vmem:[#allocation9 + $0x48] sm:$0xff] }
  0x88   :  { %1521 = vmatpush3.bf16.msra.mxu1 %v2221_v6  ;;  %343 = vmatprep.mubr.f32.mxu1 %v2272_v62  ;;  %v1500_v21 = vpack.c.bf16 %v147_v41, %v146_v38  ;;  %v1502_v6 = vpack.c.bf16 %v2291_v12, %v2289_v11  ;;  %v2305_v29 = vpack.c.bf16 %v168_v27, %v167_v23  ;;  %v2312_v38 = vld [vmem:[#allocation6] sm:$0xff]  ;;  %v172_v41 = vld [vmem:[#allocation9 + $0x28] sm:$0xff] }
  0x89   :  { %868 = vst [vmem:[#allocation17 + $0x60] sm:$0xff] %v2276_v63  ;;  %869 = vst [vmem:[#allocation17 + $0x68] sm:$0xff] %v2278_v2  ;;  %1523 = vmatprep.subr.bf16.mxu1 %v2225_v7  ;;  %v2295_v15 = vadd.f32 %v802_v9, %v768_v5  ;;  %v2297_v16 = vadd.f32 %v803_v10, %v769_v8  ;;  %v1504_v7 = vpack.c.bf16 %v149_v4, %v148_v3  ;;  %v177_v3 = vld [vmem:[#allocation9 + $0x50] sm:$0xff]  ;;  %v178_v4 = vld [vmem:[#allocation9 + $0x58] sm:$0xff] }
  0x8a   :  { %1497 = vmatpush3.bf16.msra.mxu0 %v1496_v61  ;;  %v2322_v46 = vpack.c.bf16 %v174_v45, %v173_v44  ;;  %v2330_v5 = vpack.c.bf16 %v178_v4, %v177_v3  ;;  %v179_v8 = vld [vmem:[#allocation9 + $0x60] sm:$0xff]  ;;  %v181_v10 = vld [vmem:[#allocation9 + $0x70] sm:$0xff]  ;;  %v806_v23 = vmul.f32 %v2151_v1, %v2159_v18  ;;  %v807_v27 = vmul.f32 %v2151_v1, %v2165_v22  ;;  %v742_v4 = vld [vmem:[#allocation12 + $0xa8] sm:$0xff] }
  0x8b   :  { %1499 = vmatprep.subr.bf16.mxu0 %v1498_v55  ;;  %870 = vst [vmem:[#allocation17 + $0x70] sm:$0xff] %v2295_v15  ;;  %871 = vst [vmem:[#allocation17 + $0x78] sm:$0xff] %v2297_v16  ;;  %v808_v44 = vmul.f32 %v2151_v1, %v2171_v30  ;;  %v809_v45 = vmul.f32 %v2151_v1, %v2180_v35  ;;  %v741_v3 = vld [vmem:[#allocation12 + $0xa0] sm:$0xff]  ;;  %v811_v30 = vmul.f32 %v2151_v1, %v2193_v47 }
  0x8c   :  { %1525 = vmatpush3.bf16.msra.mxu1 %v1492_v34  ;;  %v2310_v34 = vpack.c.bf16 %v170_v37, %v169_v36  ;;  %v739_v36 = vld [vmem:[#allocation12 + $0x90] sm:$0xff]  ;;  %v740_v37 = vld [vmem:[#allocation12 + $0x98] sm:$0xff]  ;;  %v774_v22 = vmul.f32 %v2149_v0, %v741_v3 }
  0x8d   :  { %1527 = vmatprep.subr.bf16.mxu1 %v1494_v40  ;;  %v171_v40 = vld [vmem:[#allocation9 + $0x20] sm:$0xff] }
  0x8e   :  { %1501 = vmatpush3.bf16.msra.mxu0 %v1500_v21  ;;  %v2318_v42 = vpack.c.bf16 %v172_v41, %v171_v40  ;;  %v772_v40 = vmul.f32 %v2149_v0, %v739_v36  ;;  %v773_v41 = vmul.f32 %v2149_v0, %v740_v37 }
  0x8f   :  { %1503 = vmatprep.subr.bf16.mxu0 %v1502_v6 }
  0x90   :  { %1529 = vmatpush3.bf16.msra.mxu1 %v1496_v61  ;;  %v2326_v61 = vpack.c.bf16 %v176_v56, %v175_v54  ;;  %v838_v54 = vadd.f32 %v806_v23, %v772_v40  ;;  %v839_v56 = vadd.f32 %v807_v27, %v773_v41  ;;  %v744_v23 = vld [vmem:[#allocation12 + $0xb8] sm:$0xff]  ;;  %v812_v40 = vmul.f32 %v2151_v1, %v2205_v57 }
  0x91   :  { %1531 = vmatprep.subr.bf16.mxu1 %v1498_v55  ;;  %v180_v55 = vld [vmem:[#allocation9 + $0x68] sm:$0xff]  ;;  %v777_v37 = vmul.f32 %v2149_v0, %v744_v23  ;;  %v815_v57 = vmul.f32 %v2151_v1, %v2238_v20 }
  0x92   :  { %1505 = vmatpush3.bf16.msra.mxu0 %v1504_v7  ;;  %v2334_v9 = vpack.c.bf16 %v180_v55, %v179_v8  ;;  %874 = vst [vmem:[#allocation17 + $0x90] sm:$0xff] %v838_v54  ;;  %875 = vst [vmem:[#allocation17 + $0x98] sm:$0xff] %v839_v56  ;;  %v2357_v18 = vpack.c.bf16 %v839_v56, %v838_v54  ;;  %v775_v8 = vmul.f32 %v2149_v0, %v742_v4 }
  0x93   :  { %1538 = vmatprep.subr.bf16.mxu0 %v1967_v33  ;;  %v810_v55 = vmul.f32 %v2151_v1, %v2187_v43  ;;  %v813_v43 = vmul.f32 %v2151_v1, %v2207_v58  ;;  %v843_v47 = vadd.f32 %v811_v30, %v777_v37  ;;  %v814_v4 = vmul.f32 %v2151_v1, %v2236_v17  ;;  %v750_v37 = vld [vmem:[#allocation12 + $0xe8] sm:$0xff] }
  0x94   :  { %1533 = vmatpush3.bf16.msra.mxu1 %v1500_v21  ;;  %v182_v21 = vld [vmem:[#allocation9 + $0x78] sm:$0xff]  ;;  %v841_v35 = vadd.f32 %v809_v45, %v775_v8  ;;  %v746_v45 = vld [vmem:[#allocation12 + $0xc8] sm:$0xff]  ;;  %v747_v8 = vld [vmem:[#allocation12 + $0xd0] sm:$0xff]  ;;  %v817_v17 = vmul.f32 %v2151_v1, %v2266_v53 }
  0x95   :  { %1535 = vmatprep.subr.bf16.mxu1 %v1502_v6  ;;  %274 = vmatmul.mubr.f32.vlgmr.msra.gmra.mrb[0].mxu0 %v2303_v28  ;;  %v2339_v6 = vpack.c.bf16 %v182_v21, %v181_v10  ;;  %v840_v10 = vadd.f32 %v808_v44, %v774_v22  ;;  %v743_v21 = vld [vmem:[#allocation12 + $0xb0] sm:$0xff]  ;;  %v745_v44 = vld [vmem:[#allocation12 + $0xc0] sm:$0xff]  ;;  %879 = vst [vmem:[#allocation17 + $0xb8] sm:$0xff] %v843_v47 }
  0x96   :  { %1540 = vmatpush3.bf16.msra.mxu0 %v2305_v29  ;;  %877 = vst [vmem:[#allocation17 + $0xa8] sm:$0xff] %v841_v35  ;;  %v776_v36 = vmul.f32 %v2149_v0, %v743_v21  ;;  %v778_v56 = vmul.f32 %v2149_v0, %v745_v44  ;;  %v779_v3 = vmul.f32 %v2149_v0, %v746_v45  ;;  %v751_v45 = vld [vmem:[#allocation12 + $0xf0] sm:$0xff] }
  0x97   :  { %1541 = vmatprep.subr.bf16.mxu0 %v1967_v33  ;;  %876 = vst [vmem:[#allocation17 + $0xa0] sm:$0xff] %v840_v10  ;;  %v2365_v27 = vpack.c.bf16 %v841_v35, %v840_v10  ;;  %v780_v10 = vmul.f32 %v2149_v0, %v747_v8  ;;  %v816_v21 = vmul.f32 %v2151_v1, %v2264_v52  ;;  %v204_v8 = vlaneseq }
  0x98   :  { %1537 = vmatpush3.bf16.msra.mxu1 %v1504_v7  ;;  %v1969_v7 = vmov 0.0   ;;  %v842_v41 = vadd.f32 %v810_v55, %v776_v36  ;;  %v844_v22 = vadd.f32 %v812_v40, %v778_v56  ;;  %v845_v58 = vadd.f32 %v813_v43, %v779_v3  ;;  %v748_v55 = vld [vmem:[#allocation12 + $0xd8] sm:$0xff]  ;;  %v749_v36 = vld [vmem:[#allocation12 + $0xe0] sm:$0xff] }
  0x99   :  { %1562 = vmatprep.subr.bf16.mxu1 %v1967_v33  ;;  %1366 = vmatprep.mubr.msk.f32.mxu0 %vm1968_vm0, %v1969_v7  ;;  %v781_v35 = vmul.f32 %v2149_v0, %v748_v55  ;;  %v846_v23 = vadd.f32 %v814_v4, %v780_v10  ;;  %v782_v43 = vmul.f32 %v2149_v0, %v749_v36  ;;  %v752_v56 = vld [vmem:[#allocation12 + $0xf8] sm:$0xff]  ;;  %v2409_v10 = vld [vmem:[%s2644_s4] sm:$0x1] }
  0x9a   :  { %1543 = vmatpush3.bf16.msra.mxu0 %v2310_v34  ;;  %878 = vst [vmem:[#allocation17 + $0xb0] sm:$0xff] %v842_v41  ;;  %v2373_v54 = vpack.c.bf16 %v843_v47, %v842_v41  ;;  %880 = vst [vmem:[#allocation17 + $0xc0] sm:$0xff] %v844_v22  ;;  %v2381_v30 = vpack.c.bf16 %v845_v58, %v844_v22  ;;  %v783_v41 = vmul.f32 %v2149_v0, %v750_v37 }
  0x9b   :  { %344 = vmatmul.mubr.f32.vlgmr.msra.gmra.mrb[0].mxu1 %v2312_v38  ;;  %1544 = vmatprep.subr.bf16.mxu0 %v1967_v33  ;;  %881 = vst [vmem:[#allocation17 + $0xc8] sm:$0xff] %v845_v58  ;;  %v847_v20 = vadd.f32 %v815_v57, %v781_v35  ;;  %882 = vst [vmem:[#allocation17 + $0xd0] sm:$0xff] %v846_v23  ;;  %v818_v47 = vmul.f32 %v2151_v1, %v2289_v11 }
  0x9c   :  { %1401 = vmatprep.mubr.msk.f32.mxu1 %vm1968_vm0, %v1969_v7  ;;  %v819_v52 = vmul.f32 %v2151_v1, %v2291_v12  ;;  %v848_v44 = vadd.f32 %v816_v21, %v782_v43  ;;  %v849_v53 = vadd.f32 %v817_v17, %v783_v41  ;;  %v784_v4 = vmul.f32 %v2149_v0, %v751_v45  ;;  %v198_v41 = vld [vmem:[#allocation11 + $0x60] sm:$0xff] }
  0x9d   :  { %883 = vst [vmem:[#allocation17 + $0xd8] sm:$0xff] %v847_v20  ;;  %v2389_v40 = vpack.c.bf16 %v847_v20, %v846_v23  ;;  %v785_v57 = vmul.f32 %v2149_v0, %v752_v56  ;;  %v2403_v12 = vshrl.u32 %v204_v8, 7  ;;  %v854_v56 = vmul.f32 %v2151_v1, %v2409_v10 }
  0x9e   :  { %1546 = vmatpush3.bf16.msra.mxu0 %v2318_v42  ;;  %884 = vst [vmem:[#allocation17 + $0xe0] sm:$0xff] %v848_v44  ;;  %885 = vst [vmem:[#allocation17 + $0xe8] sm:$0xff] %v849_v53  ;;  %v2397_v3 = vpack.c.bf16 %v849_v53, %v848_v44  ;;  %v850_v22 = vadd.f32 %v818_v47, %v784_v4  ;;  %v199_v47 = vld [vmem:[#allocation11 + $0x68] sm:$0xff]  ;;  %v200_v44 = vld [vmem:[#allocation11 + $0x70] sm:$0xff] }
  0x9f   :  { %1547 = vmatprep.subr.bf16.mxu0 %v1967_v33  ;;  %v851_v58 = vadd.f32 %v819_v52, %v785_v57  ;;  %v206_v55 = vsub.s32 0, %v2403_v12  ;;  %v2509_v52 = vpack.c.bf16 %v199_v47, %v198_v41  ;;  %v201_v53 = vld [vmem:[#allocation11 + $0x78] sm:$0xff]  ;;  %v852_v4 = vld [vmem:[%s2652_s12] sm:$0x1] }
  0xa0   :  { %886 = vst [vmem:[#allocation17 + $0xf0] sm:$0xff] %v850_v22  ;;  %v2513_v45 = vpack.c.bf16 %v201_v53, %v200_v44  ;;  %v853_v57 = vmul.f32 %v852_v4, %v2149_v0  ;;  %v1123_v4 = vld [vmem:[%s2647_s7] ss:$0 sm:$0xff] }
  0xa1   :  { %887 = vst [vmem:[#allocation17 + $0xf8] sm:$0xff] %v851_v58  ;;  %v2401_v11 = vpack.c.bf16 %v851_v58, %v850_v22  ;;  %v207_v21 = vrot.slane %v2409_v10, %v206_v55  ;;  %v1122_v58 = vld [vmem:[%s2646_s6] ss:$0 sm:$0xff] }
  0xa2   :  { %1549 = vmatpush3.bf16.msra.mxu0 %v2322_v46  ;;  %v855_v22 = vadd.f32 %v854_v56, %v853_v57 }
  0xa3   :  { %1550 = vmatprep.subr.bf16.mxu0 %v1967_v33 }
  0xa4   :  { %888 = vst [vmem:[#allocation18] sm:$0x1] %v855_v22 }
  0xa6   :  { %1552 = vmatpush3.bf16.msra.mxu0 %v2326_v61 }
  0xa7   :  { %1553 = vmatprep.subr.bf16.mxu0 %v1967_v33 }
  0xaa   :  { %1555 = vmatpush3.bf16.msra.mxu0 %v2330_v5 }
  0xab   :  { %1556 = vmatprep.subr.bf16.mxu0 %v1967_v33 }
  0xae   :  { %1558 = vmatpush3.bf16.msra.mxu0 %v2334_v9 }
  0xaf   :  { %1559 = vmatprep.subr.bf16.mxu0 %v1967_v33 }
  0xb2   :  { %1561 = vmatpush3.bf16.msra.mxu0 %v2339_v6 }
  0xb3   :  { %1586 = vmatprep.subr.bf16.mxu0 %v1967_v33 }
 0x168   :  { %v1158_v35 = vpop.f32.mrb[0].mxu0 }
 0x169   :  { %v1159_v17 = vpop.f32.mrb[1].mxu0 }
 0x16a   :  { %v1160_v23 = vadd.f32 %v1159_v17, %v1158_v35 }
 0x16c   :  { %v276_v20 = vadd.f32 %v1160_v23, %v207_v21 }
 0x16e   :  { %v1193_v36 = vpop.f32.mrb[0].mxu1  ;;  %1367 = vmatmul.mubr.f32.vlgmr.msra.gmra.mrb[2].mxu0 %v276_v20 }
 0x16f   :  { %v1194_v37 = vpop.f32.mrb[1].mxu1  ;;  %1588 = vmatpush3.bf16.msra.mxu0 %v2305_v29  ;;  %1436 = vmatprep.mubr.msk.f32.mxu0 %vm1968_vm0, %v1969_v7  ;;  %v2432_v29 = vpack.c.bf16 %v2167_v25, %v2161_v19  ;;  %v2450_v19 = vpack.c.bf16 %v2213_v60, %v2211_v59  ;;  %v2456_v25 = vpack.c.bf16 %v2232_v14, %v2230_v13  ;;  %v186_v59 = vld [vmem:[#allocation11] sm:$0xff]  ;;  %v187_v60 = vld [vmem:[#allocation11 + $0x8] sm:$0xff]  ;;  %v188_v14 = vld [vmem:[#allocation11 + $0x10] sm:$0xff] }
 0x170   :  { %v1195_v43 = vadd.f32 %v1194_v37, %v1193_v36  ;;  %1589 = vmatprep.subr.bf16.mxu0 %v1967_v33  ;;  %v2485_v13 = vpack.c.bf16 %v187_v60, %v186_v59 }
 0x172   :  { %1564 = vmatpush3.bf16.msra.mxu1 %v2485_v13 }
 0x173   :  { %1591 = vmatpush3.bf16.msra.mxu0 %v2310_v34  ;;  %v346_v34 = vadd.f32 %v1195_v43, %v207_v21  ;;  %1565 = vmatprep.subr.bf16.mxu1 %v1967_v33 }
 0x174   :  { %1592 = vmatprep.subr.bf16.mxu0 %v1967_v33 }
 0x177   :  { %1594 = vmatpush3.bf16.msra.mxu0 %v2318_v42  ;;  %v2437_v42 = vpack.c.bf16 %v2176_v32, %v2174_v31  ;;  %v2462_v31 = vpack.c.bf16 %v2244_v26, %v2242_v24  ;;  %v2468_v32 = vpack.c.bf16 %v2262_v51, %v2260_v50  ;;  %v189_v24 = vld [vmem:[#allocation11 + $0x18] sm:$0xff]  ;;  %v190_v50 = vld [vmem:[#allocation11 + $0x20] sm:$0xff]  ;;  %v191_v51 = vld [vmem:[#allocation11 + $0x28] sm:$0xff] }
 0x178   :  { %1595 = vmatprep.subr.bf16.mxu0 %v1967_v33  ;;  %v2489_v26 = vpack.c.bf16 %v189_v24, %v188_v14 }
 0x17a   :  { %1567 = vmatpush3.bf16.msra.mxu1 %v2489_v26 }
 0x17b   :  { %1597 = vmatpush3.bf16.msra.mxu0 %v2322_v46  ;;  %v2443_v46 = vpack.c.bf16 %v2197_v49, %v2195_v48  ;;  %v2474_v48 = vpack.c.bf16 %v2278_v2, %v2276_v63  ;;  %v2480_v49 = vpack.c.bf16 %v2297_v16, %v2295_v15  ;;  %1568 = vmatprep.subr.bf16.mxu1 %v1967_v33  ;;  %v192_v63 = vld [vmem:[#allocation11 + $0x30] sm:$0xff]  ;;  %v193_v2 = vld [vmem:[#allocation11 + $0x38] sm:$0xff]  ;;  %v194_v16 = vld [vmem:[#allocation11 + $0x40] sm:$0xff] }
 0x17c   :  { %1598 = vmatprep.subr.bf16.mxu0 %v1967_v33  ;;  %v2497_v15 = vpack.c.bf16 %v193_v2, %v192_v63 }
 0x17f   :  { %1600 = vmatpush3.bf16.msra.mxu0 %v2326_v61 }
 0x180   :  { %1601 = vmatprep.subr.bf16.mxu0 %v1967_v33 }
 0x183   :  { %1603 = vmatpush3.bf16.msra.mxu0 %v2330_v5  ;;  %v196_v5 = vld [vmem:[#allocation11 + $0x50] sm:$0xff] }
 0x184   :  { %1604 = vmatprep.subr.bf16.mxu0 %v1967_v33 }
 0x187   :  { %1606 = vmatpush3.bf16.msra.mxu0 %v2334_v9  ;;  %v197_v9 = vld [vmem:[#allocation11 + $0x58] sm:$0xff] }
 0x188   :  { %1607 = vmatprep.subr.bf16.mxu0 %v1967_v33 }
 0x18b   :  { %1609 = vmatpush3.bf16.msra.mxu0 %v2339_v6  ;;  %v2505_v6 = vpack.c.bf16 %v197_v9, %v196_v5 }
 0x18c   :  { %1635 = vmatprep.subr.bf16.mxu0 %v2432_v29 }
 0x18e   :  { %1437 = vmatmul.mubr.f32.vlgmr.msra.gmra.mrb[4].mxu0 %v346_v34 }
 0x18f   :  { %1637 = vmatpush3.bf16.msra.mxu0 %v2437_v42  ;;  %959 = vmatprep.mubr.f32.mxu0 %v2272_v62  ;;  %v2493_v62 = vpack.c.bf16 %v191_v51, %v190_v50 }
 0x190   :  { %1639 = vmatprep.subr.bf16.mxu0 %v2357_v18 }
 0x191   :  { %1570 = vmatpush3.bf16.msra.mxu1 %v2493_v62 }
 0x192   :  { %1571 = vmatprep.subr.bf16.mxu1 %v1967_v33 }
 0x193   :  { %1641 = vmatpush3.bf16.msra.mxu0 %v2443_v46 }
 0x194   :  { %1643 = vmatprep.subr.bf16.mxu0 %v2365_v27 }
 0x195   :  { %1573 = vmatpush3.bf16.msra.mxu1 %v2497_v15 }
 0x196   :  { %1574 = vmatprep.subr.bf16.mxu1 %v1967_v33 }
 0x197   :  { %1645 = vmatpush3.bf16.msra.mxu0 %v2450_v19 }
 0x198   :  { %1647 = vmatprep.subr.bf16.mxu0 %v2373_v54 }
 0x19b   :  { %1649 = vmatpush3.bf16.msra.mxu0 %v2456_v25 }
 0x19c   :  { %1651 = vmatprep.subr.bf16.mxu0 %v2381_v30 }
 0x19f   :  { %1653 = vmatpush3.bf16.msra.mxu0 %v2462_v31 }
 0x1a0   :  { %1655 = vmatprep.subr.bf16.mxu0 %v2389_v40 }
 0x1a3   :  { %1657 = vmatpush3.bf16.msra.mxu0 %v2468_v32 }
 0x1a4   :  { %1659 = vmatprep.subr.bf16.mxu0 %v2397_v3 }
 0x1a7   :  { %1661 = vmatpush3.bf16.msra.mxu0 %v2474_v48 }
 0x1a8   :  { %1663 = vmatprep.subr.bf16.mxu0 %v2401_v11 }
 0x1ab   :  { %1665 = vmatpush3.bf16.msra.mxu0 %v2480_v49 }
 0x1ae   :  { %960 = vmatmul.mubr.f32.vlgmr.msra.gmra.mrb[6].mxu0 %v2312_v38  ;;  %v195_v38 = vld [vmem:[#allocation11 + $0x48] sm:$0xff] }
 0x1af   :  { %v2501_v61 = vpack.c.bf16 %v195_v38, %v194_v16 }
 0x1b1   :  { %1576 = vmatpush3.bf16.msra.mxu1 %v2501_v61 }
 0x1b2   :  { %1577 = vmatprep.subr.bf16.mxu1 %v1967_v33 }
 0x1b5   :  { %1579 = vmatpush3.bf16.msra.mxu1 %v2505_v6 }
 0x1b6   :  { %1580 = vmatprep.subr.bf16.mxu1 %v1967_v33 }
 0x1b9   :  { %1582 = vmatpush3.bf16.msra.mxu1 %v2509_v52 }
 0x1ba   :  { %1583 = vmatprep.subr.bf16.mxu1 %v1967_v33 }
 0x1bd   :  { %1585 = vmatpush3.bf16.msra.mxu1 %v2513_v45 }
 0x1be   :  { %1610 = vmatprep.subr.bf16.mxu1 %v1967_v33 }
 0x241   :  { %v421_v8 = vpop.f32.mrb[2].mxu0 }
 0x242   :  { %v422_v35 = vadd.f32 %v1122_v58, %v421_v8  ;;  %v1368_v21 = vpop.f32.mrb[3].mxu0 }
 0x244   :  { %v425_v17 = vrot.slane %v422_v35, 4 }
 0x246   :  { %v426_v23 = vadd.f32 %v425_v17, %v422_v35 }
 0x248   :  { %v427_v20 = vrot.slane %v426_v23, 2 }
 0x24a   :  { %v428_v36 = vadd.f32 %v427_v20, %v426_v23 }
 0x24c   :  { %v429_v1 = vrot.slane %v428_v36, 1 }
 0x24e   :  { %v430_v10 = vadd.f32 %v429_v1, %v428_v36 }
 0x250   :  { %v432_v37 = vmul.f32 0.125, %v430_v10 }
 0x252   :  { %v433_v43 = vsub.f32 %v422_v35, %v432_v37 }
 0x254   :  { %v434_v34 = vmul.f32 %v433_v43, %v433_v43 }
 0x256   :  { %v435_v59 = vrot.slane %v434_v34, 4 }
 0x258   :  { %v436_v0 = vadd.f32 %v435_v59, %v434_v34 }
 0x25a   :  { %v437_v60 = vrot.slane %v436_v0, 2 }
 0x25c   :  { %v438_v14 = vadd.f32 %v437_v60, %v436_v0  ;;  %v2540_v0 = vrot.slane %v855_v22, %v206_v55 }
 0x25e   :  { %v439_v24 = vrot.slane %v438_v14, 1 }
 0x260   :  { %v440_v50 = vadd.f32 %v439_v24, %v438_v14 }
 0x261   :  { %v602_v51 = vpop.f32.mrb[4].mxu0 }
 0x262   :  { %v441_v63 = vmul.f32 0.125, %v440_v50  ;;  %v603_v2 = vadd.f32 %v1122_v58, %v602_v51  ;;  %v1438_v16 = vpop.f32.mrb[5].mxu0  ;;  %v1124_v58 = vld [vmem:[%s2648_s8] ss:$0 sm:$0xff] }
 0x264   :  { %v442_v38 = vadd.f32 1e-05, %v441_v63  ;;  %v606_v5 = vrot.slane %v603_v2, 4 }
 0x266   :  { %1713 = vrsqrt.f32 %v442_v38  ;;  %v607_v9 = vadd.f32 %v606_v5, %v603_v2 }
 0x268   :  { %v608_v41 = vrot.slane %v607_v9, 2 }
 0x26a   :  { %v609_v47 = vadd.f32 %v608_v41, %v607_v9 }
 0x26c   :  { %v610_v44 = vrot.slane %v609_v47, 1 }
 0x26e   :  { %v611_v53 = vadd.f32 %v610_v44, %v609_v47 }
 0x270   :  { %v1714_v56 = vpop.eup %1713  ;;  %v612_v57 = vmul.f32 0.125, %v611_v53 }
 0x271   :  { %v444_v8 = vmul.f32 %v1714_v56, %v433_v43 }
 0x272   :  { %v613_v35 = vsub.f32 %v603_v2, %v612_v57 }
 0x273   :  { %v451_v21 = vmul.f32 %v1123_v4, %v444_v8 }
 0x274   :  { %v614_v17 = vmul.f32 %v613_v35, %v613_v35 }
 0x275   :  { %v458_v23 = vadd.f32 %v1124_v58, %v451_v21 }
 0x276   :  { %v615_v20 = vrot.slane %v614_v17, 4 }
 0x277   :  { %v459_v36 = vmax.f32 %v458_v23, 0.0 }
 0x278   :  { %v616_v1 = vadd.f32 %v615_v20, %v614_v17 }
 0x279   :  { %1402 = vmatmul.mubr.f32.vlgmr.msra.gmra.mrb[2].mxu1 %v459_v36 }
 0x27a   :  { %v617_v10 = vrot.slane %v616_v1, 2  ;;  %1612 = vmatpush3.bf16.msra.mxu1 %v2485_v13  ;;  %1471 = vmatprep.mubr.msk.f32.mxu1 %vm1968_vm0, %v1969_v7 }
 0x27b   :  { %1613 = vmatprep.subr.bf16.mxu1 %v1967_v33 }
 0x27c   :  { %v618_v37 = vadd.f32 %v617_v10, %v616_v1 }
 0x27e   :  { %v619_v43 = vrot.slane %v618_v37, 1  ;;  %1615 = vmatpush3.bf16.msra.mxu1 %v2489_v26 }
 0x27f   :  { %1616 = vmatprep.subr.bf16.mxu1 %v1967_v33 }
 0x280   :  { %v620_v34 = vadd.f32 %v619_v43, %v618_v37 }
 0x281   :  { %v1296_v59 = vpop.f32.mrb[6].mxu0 }
 0x282   :  { %v621_v60 = vmul.f32 0.125, %v620_v34  ;;  %1618 = vmatpush3.bf16.msra.mxu1 %v2493_v62  ;;  %v1297_v13 = vpop.f32.mrb[7].mxu0 }
 0x283   :  { %1619 = vmatprep.subr.bf16.mxu1 %v1967_v33  ;;  %v1298_v7 = vadd.f32 %v1297_v13, %v1296_v59 }
 0x284   :  { %v622_v14 = vadd.f32 1e-05, %v621_v60 }
 0x285   :  { %v962_v24 = vadd.f32 %v1298_v7, %v2540_v0 }
 0x286   :  { %1715 = vrsqrt.f32 %v622_v14  ;;  %1621 = vmatpush3.bf16.msra.mxu1 %v2497_v15 }
 0x287   :  { %1622 = vmatprep.subr.bf16.mxu1 %v1967_v33  ;;  %v1035_v26 = vmul.f32 %v962_v24, %v962_v24 }
 0x289   :  { %1036 = vadd.xlane.f32.xlu0 %v1035_v26 }
 0x28a   :  { %1624 = vmatpush3.bf16.msra.mxu1 %v2501_v61 }
 0x28b   :  { %1625 = vmatprep.subr.bf16.mxu1 %v1967_v33 }
 0x28e   :  { %1627 = vmatpush3.bf16.msra.mxu1 %v2505_v6 }
 0x28f   :  { %1628 = vmatprep.subr.bf16.mxu1 %v1967_v33 }
 0x290   :  { %v1716_v12 = vpop.eup %1715 }
 0x291   :  { %v624_v55 = vmul.f32 %v1716_v12, %v613_v35 }
 0x292   :  { %1630 = vmatpush3.bf16.msra.mxu1 %v2509_v52 }
 0x293   :  { %v625_v62 = vmul.f32 %v1123_v4, %v624_v55  ;;  %1631 = vmatprep.subr.bf16.mxu1 %v1967_v33  ;;  %v1041_v33 = vmul.f32 1e+12, %v962_v24 }
 0x295   :  { %v626_v15 = vadd.f32 %v1124_v58, %v625_v62 }
 0x296   :  { %1633 = vmatpush3.bf16.msra.mxu1 %v2513_v45 }
 0x297   :  { %v627_v22 = vmax.f32 %v626_v15, 0.0  ;;  %1667 = vmatprep.subr.bf16.mxu1 %v2432_v29 }
 0x299   :  { %1472 = vmatmul.mubr.f32.vlgmr.msra.gmra.mrb[4].mxu1 %v627_v22 }
 0x29a   :  { %1669 = vmatpush3.bf16.msra.mxu1 %v2437_v42  ;;  %1029 = vmatprep.mubr.f32.mxu1 %v2251_v39 }
 0x29b   :  { %1671 = vmatprep.subr.bf16.mxu1 %v2357_v18 }
 0x29e   :  { %1673 = vmatpush3.bf16.msra.mxu1 %v2443_v46 }
 0x29f   :  { %1675 = vmatprep.subr.bf16.mxu1 %v2365_v27 }
 0x2a2   :  { %1677 = vmatpush3.bf16.msra.mxu1 %v2450_v19 }
 0x2a3   :  { %1679 = vmatprep.subr.bf16.mxu1 %v2373_v54 }
 0x2a6   :  { %1681 = vmatpush3.bf16.msra.mxu1 %v2456_v25 }
 0x2a7   :  { %1683 = vmatprep.subr.bf16.mxu1 %v2381_v30  ;;  %v1125_v30 = vld [vmem:[%s2650_s10] ss:$0 sm:$0xff]  ;;  %s1857_s10 = scalar_lea.vmem %s1100_s19, 16 }
 0x2a8   :  { %p1858_p6 = scmp.ne.s32.totalorder %s1100_s19, %s1857_s10  ;;  %p1863_p8 = scmp.lt.s32.totalorder %s1861_s29, %s1857_s10 }
 0x2aa   :  { %1685 = vmatpush3.bf16.msra.mxu1 %v2462_v31  ;;  %p1864_p9 = por %p1863_p8, %p1862_p7 }
 0x2ab   :  { %1687 = vmatprep.subr.bf16.mxu1 %v2389_v40 }
 0x2ac   :  { %p1865_p10 = pnand %p1864_p9, %p1858_p6 }
 0x2ae   :  { %1689 = vmatpush3.bf16.msra.mxu1 %v2468_v32 }
 0x2af   :  { %1691 = vmatprep.subr.bf16.mxu1 %v2397_v3 }
 0x2b2   :  { %1693 = vmatpush3.bf16.msra.mxu1 %v2474_v48 }
 0x2b3   :  { %1695 = vmatprep.subr.bf16.mxu1 %v2401_v11 }
 0x2b6   :  { %1697 = vmatpush3.bf16.msra.mxu1 %v2480_v49 }
 0x2b9   :  { %1030 = vmatmul.mubr.f32.vlgmr.msra.gmra.mrb[6].mxu1 %v2303_v28 }
 0x316   :  { %v1037_v39 = vpop.xlane.xlu0 %1036 }
 0x317   :  { %1717 = vrsqrt.f32 %v1037_v39  ;;  %vm1039_vm1 = vcmp.gt.f32.partialorder %v1037_v39, 1e-24 }
 0x321   :  { %v1718_v18 = vpop.eup %1717 }
 0x322   :  { %v1040_v27 = vmul.f32 %v1718_v18, %v962_v24 }
 0x324   :  { %v1044_v54 = vsel %vm1039_vm1, %v1040_v27, %v1041_v33 }
 0x325   :  { %1045 = vst [vmem:[#allocation15] sm:$0xff] %v1044_v54 }
 0x34c   :  { %v532_v40 = vpop.f32.mrb[2].mxu1 }
 0x34d   :  { %v533_v3 = vadd.f32 %v1125_v30, %v532_v40  ;;  %v1403_v29 = vpop.f32.mrb[3].mxu1 }
 0x34f   :  { %v698_v11 = vmul.f32 %v533_v3, %v533_v3 }
 0x351   :  { %699 = vadd.xlane.f32.xlu1 %v698_v11 }
 0x36c   :  { %v694_v42 = vpop.f32.mrb[4].mxu1 }
 0x36d   :  { %v695_v46 = vadd.f32 %v1125_v30, %v694_v42  ;;  %v1473_v28 = vpop.f32.mrb[5].mxu1 }
 0x36f   :  { %v709_v19 = vmul.f32 %v695_v46, %v695_v46 }
 0x371   :  { %710 = vadd.xlane.f32.xlu1 %v709_v19 }
 0x38c   :  { %v1331_v25 = vpop.f32.mrb[6].mxu1 }
 0x38d   :  { %v1332_v31 = vpop.f32.mrb[7].mxu1 }
 0x38e   :  { %v1333_v32 = vadd.f32 %v1332_v31, %v1331_v25 }
 0x390   :  { %v1032_v48 = vadd.f32 %v1333_v32, %v2540_v0 }
 0x392   :  { %v1046_v49 = vmul.f32 %v1032_v48, %v1032_v48 }
 0x394   :  { %1047 = vadd.xlane.f32.xlu0 %v1046_v49 }
 0x395   :  { %1868 = shalt.err (!%p1865_p10)
}
 0x396   :  { %s1869_s17 = scalar_lea.hbm %s2656_s16, 16 }
 0x397   :  { %p1870_p11 = scmp.ne.s32.totalorder %s2656_s16, %s1869_s17  ;;  %p1873_p12 = scmp.lt.u32.totalorder %s1869_s17, %s2656_s16 }
 0x399   :  { %p1875_p13 = pnand %p1873_p12, %p1870_p11 }
 0x39b   :  { %1878 = shalt.err (!%p1875_p13)
}
 0x39c   :  { %1102 = dma.vmem_to_hbm [thread:$0]  %s1100_s19, 16, %s2656_s16, [#allocation19]   ;;  %v704_v52 = vmul.f32 1e+12, %v533_v3  ;;  %v715_v2 = vmul.f32 1e+12, %v695_v46 }
 0x39d   :  { %s1971_s11 = smov [#allocation14]  }
 0x39e   :  { %s1062_s25 = sshll.u32 %s1971_s11, 4  ;;  %s1063_s25 = int_to_ptr.vmem [resolvable:$true] %s1062_s25 }
 0x39f   :  { %s1879_s16 = scalar_lea.vmem %s1063_s25, 256  ;;  %p1884_p1 = scmp.lt.s32.totalorder %s1063_s25, %s1063_s25 }
 0x3a0   :  { %p1880_p0 = scmp.ne.s32.totalorder %s1063_s25, %s1879_s16  ;;  %p1885_p2 = scmp.lt.s32.totalorder %s1879_s16, %s1879_s16 }
 0x3a2   :  { %p1886_p3 = por %p1885_p2, %p1884_p1 }
 0x3a4   :  { %p1887_p4 = pnand %p1886_p3, %p1880_p0 }
 0x3de   :  { %v700_v61 = vpop.xlane.xlu1 %699 }
 0x3df   :  { %1719 = vrsqrt.f32 %v700_v61  ;;  %vm702_vm2 = vcmp.gt.f32.partialorder %v700_v61, 1e-24 }
 0x3e9   :  { %v1720_v6 = vpop.eup %1719 }
 0x3ea   :  { %v703_v45 = vmul.f32 %v1720_v6, %v533_v3 }
 0x3ec   :  { %v707_v50 = vsel %vm702_vm2, %v703_v45, %v704_v52 }
 0x3ed   :  { %708 = vst [vmem:[#allocation14] sm:$0xff] %v707_v50 }
 0x3fe   :  { %v711_v51 = vpop.xlane.xlu1 %710 }
 0x3ff   :  { %1721 = vrsqrt.f32 %v711_v51  ;;  %vm713_vm3 = vcmp.gt.f32.partialorder %v711_v51, 1e-24 }
 0x409   :  { %v1722_v63 = vpop.eup %1721 }
 0x40a   :  { %v714_v16 = vmul.f32 %v1722_v63, %v695_v46 }
 0x40c   :  { %v718_v38 = vsel %vm713_vm3, %v714_v16, %v715_v2 }
 0x40d   :  { %719 = vst [vmem:[#allocation14 + $0x8] sm:$0xff] %v718_v38 }
 0x40e   :  { %1890 = shalt.err (!%p1887_p4)
}
 0x40f   :  { %s1891_s27 = scalar_lea.hbm %s2653_s13, 256 }
 0x410   :  { %p1892_p5 = scmp.ne.s32.totalorder %s2653_s13, %s1891_s27  ;;  %p1895_p6 = scmp.lt.u32.totalorder %s1891_s27, %s2653_s13 }
 0x412   :  { %p1897_p7 = pnand %p1895_p6, %p1892_p5 }
 0x414   :  { %1900 = shalt.err (!%p1897_p7)
}
 0x415   :  { %1068 = dma.vmem_to_hbm [thread:$0]  %s1063_s25, 256, %s2653_s13, [#allocation5], %s1962_s22, %s1962_s22, %s1963_s30   ;;  %v1052_v41 = vmul.f32 1e+12, %v1032_v48 }
 0x416   :  { %s1972_s8 = smov [#allocation15]   ;;  %s1973_s19 = smov [#allocation17]  }
 0x417   :  { %s1074_s5 = sshll.u32 %s1972_s8, 4  ;;  %s1086_s10 = sshll.u32 %s1973_s19, 4  ;;  %s1075_s5 = int_to_ptr.vmem [resolvable:$true] %s1074_s5  ;;  %s2603_s10 = int_to_ptr.vmem [resolvable:$true] %s1086_s10 }
 0x418   :  { %s1901_s29 = scalar_lea.vmem %s1075_s5, 256  ;;  %p1906_p9 = scmp.lt.s32.totalorder %s1075_s5, %s1075_s5 }
 0x419   :  { %p1902_p8 = scmp.ne.s32.totalorder %s1075_s5, %s1901_s29  ;;  %p1907_p10 = scmp.lt.s32.totalorder %s1901_s29, %s1901_s29 }
 0x41b   :  { %p1908_p11 = por %p1907_p10, %p1906_p9 }
 0x41d   :  { %p1909_p12 = pnand %p1908_p11, %p1902_p8 }
 0x421   :  { %v1048_v5 = vpop.xlane.xlu0 %1047 }
 0x422   :  { %1723 = vrsqrt.f32 %v1048_v5  ;;  %vm1050_vm4 = vcmp.gt.f32.partialorder %v1048_v5, 1e-24 }
 0x42c   :  { %v1724_v9 = vpop.eup %1723 }
 0x42d   :  { %v1051_v47 = vmul.f32 %v1724_v9, %v1032_v48 }
 0x42f   :  { %v1055_v44 = vsel %vm1050_vm4, %v1051_v47, %v1052_v41 }
 0x430   :  { %1056 = vst [vmem:[#allocation15 + $0x8] sm:$0xff] %v1055_v44 }
 0x431   :  { %1912 = shalt.err (!%p1909_p12)
}
 0x432   :  { %s1913_s9 = scalar_lea.hbm %s2654_s14, 256 }
 0x433   :  { %p1914_p13 = scmp.ne.s32.totalorder %s2654_s14, %s1913_s9  ;;  %p1917_p0 = scmp.lt.u32.totalorder %s1913_s9, %s2654_s14 }
 0x435   :  { %p1919_p1 = pnand %p1917_p0, %p1914_p13 }
 0x437   :  { %1922 = shalt.err (!%p1919_p1)
}
 0x438   :  { %1080 = dma.vmem_to_hbm [thread:$0]  %s1075_s5, 256, %s2654_s14, [#allocation16], %s1962_s22, %s1962_s22, %s1963_s30  }
 0x439   :  { %s1923_s2 = scalar_lea.vmem %s2603_s10, 4096  ;;  %p1928_p3 = scmp.lt.s32.totalorder %s2603_s10, %s2603_s10 }
 0x43a   :  { %p1924_p2 = scmp.ne.s32.totalorder %s2603_s10, %s1923_s2  ;;  %p1929_p4 = scmp.lt.s32.totalorder %s1923_s2, %s1923_s2 }
 0x43c   :  { %p1930_p5 = por %p1929_p4, %p1928_p3 }
 0x43e   :  { %p1931_p6 = pnand %p1930_p5, %p1924_p2 }
 0x440   :  { %1934 = shalt.err (!%p1931_p6)
}
 0x441   :  { %s1935_s16 = scalar_lea.hbm %s2655_s15, 4096 }
 0x442   :  { %p1936_p7 = scmp.ne.s32.totalorder %s2655_s15, %s1935_s16  ;;  %p1939_p8 = scmp.lt.u32.totalorder %s1935_s16, %s2655_s15 }
 0x444   :  { %p1941_p9 = pnand %p1939_p8, %p1936_p7 }
 0x446   :  { %1944 = shalt.err (!%p1941_p9)
}
 0x447   :  { %1092 = dma.vmem_to_hbm [thread:$0]  %s2603_s10, 4096, %s2655_s15, [#allocation16], %s1962_s22, %s1962_s22, %s1963_s30  }
 0x448   :  { %1953 = dma.done.wait [#allocation5], 256  }
 0x449   :  { %1954 = vsyncadd [#allocation5], 4294967040 }
 0x44a   :  { %1955 = dma.done.wait [#allocation16], 4352  }
 0x44b   :  { %1956 = vsyncadd [#allocation16], 4294962944 }
 0x44c   :  { %1957 = dma.done.wait [#allocation19], 16  }
 0x44d   :  { %1958 = vsyncadd [#allocation19], 4294967280 }
 0x44e   :  { %1115 = vsyncpa [#allocation4], 1 }
 0x44f   :  { %1116 = vsyncpa [#allocation7], 1 }
 0x450   :  { %1117 = vsyncpa [#allocation10], 1 }
 0x451   :  { %1118 = vsyncpa [#allocation13], 1 }
 0x452   :  { %1119 = vsyncpa [#allocation5], 1 }
 0x453   :  { %1120 = vsyncpa [#allocation16], 1 }
 0x454   :  { %1121 = vsyncpa [#allocation19], 1 }

</bundles_post_ra>
